<compile_context>
chip_gen: v7x
topology: tpu7x:2x2x1
jax: 0.10.0
libtpu: 0.0.40
codegen_flags: <defaults>
</compile_context>

<pallas_src>
import jax
import jax.numpy as jnp
from jax.experimental import pallas as pl
from jax.experimental.pallas import tpu as pltpu

LANE = 128


def _round_up(x, m):
    return (x + m - 1) // m * m


def _sublane_multiple(dtype):
    # f32 -> 8, bf16 -> 16, int8/fp8 -> 32
    return max(8, 32 // jnp.dtype(dtype).itemsize)


def _choose_tile_3n(n3, min_tile=512, max_tile=4096, target_steps=16):
    """Lane-dense 3N tile sized for ~target_steps grid steps (v7x balance)."""
    n3_lane = _round_up(n3, LANE)
    if n3_lane <= min_tile:
        return n3_lane
    t3 = _round_up(pl.cdiv(n3_lane, target_steps), LANE)
    return max(min_tile, min(max_tile, t3))


# ---------------------------------------------------------------------------
# Fused kernel: streamed blendshape matmul + tiny eyes/teeth/jaw epilogue
# ---------------------------------------------------------------------------

def fuhead_kernel(act_ref, w_ref, act32_ref, wjaw_ref, rots_t_ref,
                  leye_ref, reye_ref, ltr_ref, rtr_ref, tup_ref, tlo_ref,
                  head_ref, leye_out, reye_out, tup_out, tlo_out):
    # ---- main fused blendshape matmul: one streamed weight tile per step ----
    head_ref[...] = jnp.dot(act_ref[...], w_ref[...],
                            preferred_element_type=jnp.float32)

    # ---- tiny epilogue (runs every step; cheap, idempotent, resident out) ----
    # Expression-only jaw delta (delta lanes 102:105 -> cols 0:3), f32 path.
    jaw = jnp.dot(act32_ref[...], wjaw_ref[...],
                  preferred_element_type=jnp.float32)          # (B, 128)

    rots_t = rots_t_ref[...]                                   # (B, 3, 3) == rot.T
    ltr = ltr_ref[...]                                         # (1, 3)
    rtr = rtr_ref[...]
    tup = tup_ref[...]                                         # (Nt, 3)
    tlo = tlo_ref[...]

    def rotate(v):  # v: (Ne, 3) -> (B, Ne, 3); out[b,n,e] = sum_d v[n,d]*rot[b,e,d]
        return (v[None, :, 0:1] * rots_t[:, 0:1, :]
                + v[None, :, 1:2] * rots_t[:, 1:2, :]
                + v[None, :, 2:3] * rots_t[:, 2:3, :])         # pure VPU broadcasts

    leye_out[...] = rotate(leye_ref[...]) + ltr
    reye_out[...] = rotate(reye_ref[...]) + rtr
    tup_out[...] = jnp.broadcast_to(tup[None], tup_out.shape)
    tlo_out[...] = tlo[None] + jaw[:, None, 0:3]               # lower teeth follow jaw


# ---------------------------------------------------------------------------
# Host-side packing (call once) and forward wrapper
# ---------------------------------------------------------------------------

def prepare_fuhead_params(params, weight_dtype=jnp.bfloat16, tile_3n=None):
    """One-time weight packing/transposition (hoisted out of per-call path)."""
    m_mean = jnp.asarray(params["m_mean_shape"], jnp.float32)            # (3N,)
    m_id = jnp.asarray(params["m_id_tensor"], jnp.float32)               # (3N, I)
    m_expr = jnp.asarray(params["m_expr_tensor"], jnp.float32)           # (3N, E)
    mti = jnp.asarray(params["m_transfered_iden_tensor"], jnp.float32)   # (3N, E, I)

    n3 = m_mean.shape[0]
    num_id = m_id.shape[1]
    num_expr = m_expr.shape[1]

    k_expr = num_expr
    k_pair = num_expr * num_id
    k = k_expr + k_pair + num_id + 1
    # Pad K only to the dtype sublane multiple (NOT 128): K=1088 already fits.
    kp = _round_up(k, _sublane_multiple(weight_dtype))

    # Lane-dense tiling of the 3N axis.
    t3 = tile_3n if tile_3n is not None else _choose_tile_3n(n3)
    n3_pad = t3 * pl.cdiv(n3, t3)

    # Fused weight rows: [m_expr.T ; Mti(i*E+e, :) ; m_id.T ; m_mean].
    mti_flat = jnp.transpose(mti, (2, 1, 0)).reshape(k_pair, n3)   # row = i*E + e
    w_core = jnp.concatenate(
        [m_expr.T, mti_flat, m_id.T, m_mean[None, :]], axis=0)    # (K, 3N)
    w = jnp.zeros((kp, n3_pad), jnp.float32).at[:k, :n3].set(w_core)

    # Jaw-delta weights: expression-dependent rows only; kept in f32 (off the
    # critical stream, fetched once) for tighter lower-teeth accuracy.
    wjaw = jnp.zeros((kp, LANE), jnp.float32)
    wjaw = wjaw.at[:k_expr + k_pair, 0:3].set(w_core[:k_expr + k_pair, 102:105])

    packed = dict(
        w=w.astype(weight_dtype),
        wjaw=wjaw,
        leye=jnp.asarray(params["left_eyeball_base_verts"], jnp.float32),
        reye=jnp.asarray(params["right_eyeball_base_verts"], jnp.float32),
        ltr=jnp.asarray(params["left_eye_transl"], jnp.float32)[None, :],
        rtr=jnp.asarray(params["right_eye_transl"], jnp.float32)[None, :],
        tup=jnp.asarray(params["teeth_upper_verts"], jnp.float32),
        tlo=jnp.asarray(params["teeth_lower_verts"], jnp.float32),
    )
    meta = dict(n3=n3, n3_pad=n3_pad, t3=t3, k=k, kp=kp,
                num_id=num_id, num_expr=num_expr, weight_dtype=weight_dtype)
    return packed, meta


def fuhead_forward(packed, meta, identity, expressions, eye_rots):
    n3, n3_pad, t3, kp = meta["n3"], meta["n3_pad"], meta["t3"], meta["kp"]
    num_id, num_expr = meta["num_id"], meta["num_expr"]
    wdt = meta["weight_dtype"]

    batch = expressions.shape[0]
    n_eye = packed["leye"].shape[0]
    n_teeth = packed["tup"].shape[0]

    # ---- fused activation [expr | id_i*expr_e (i major) | id | 1 | pad] ----
    identity = identity.astype(jnp.float32)
    expressions = expressions.astype(jnp.float32)
    pair = (identity[None, :, None] * expressions[:, None, :]).reshape(
        batch, num_id * num_expr)
    act32 = jnp.concatenate(
        [expressions, pair,
         jnp.broadcast_to(identity[None, :], (batch, num_id)),
         jnp.ones((batch, 1), jnp.float32)], axis=1)
    act32 = jnp.pad(act32, ((0, 0), (0, kp - act32.shape[1])))
    act = act32.astype(wdt)

    rots_t = jnp.swapaxes(eye_rots.astype(jnp.float32), -1, -2)    # (B, 3, 3)

    itemsize = jnp.dtype(wdt).itemsize
    grid_steps = n3_pad // t3

    # VMEM budget from actual need (double-buffered weight tiles dominate).
    need = (2 * kp * t3 * itemsize             # streamed weight double-buffer
            + 2 * batch * t3 * 4               # head output double-buffer
            + 2 * batch * kp * (itemsize + 4)  # activation copies (stream + f32)
            + 2 * kp * LANE * 4                # jaw weights
            + 8 * batch * (n_eye + n_teeth) * 3 * 4
            + (4 << 20))                       # compiler/layout headroom
    vmem_limit = int(max(need, 32 << 20))

    cost = pl.CostEstimate(
        flops=2 * batch * kp * (n3_pad + LANE * grid_steps),
        transcendentals=0,
        bytes_accessed=(kp * n3_pad * itemsize + kp * LANE * 4
                        + batch * kp * (itemsize + 4) + batch * n3_pad * 4))

    const2 = lambda j: (0, 0)
    const3 = lambda j: (0, 0, 0)

    head_flat, lv, rv, tu, tl = pl.pallas_call(
        fuhead_kernel,
        out_shape=(
            jax.ShapeDtypeStruct((batch, n3_pad), jnp.float32),
            jax.ShapeDtypeStruct((batch, n_eye, 3), jnp.float32),
            jax.ShapeDtypeStruct((batch, n_eye, 3), jnp.float32),
            jax.ShapeDtypeStruct((batch, n_teeth, 3), jnp.float32),
            jax.ShapeDtypeStruct((batch, n_teeth, 3), jnp.float32)),
        grid=(grid_steps,),
        in_specs=[
            pl.BlockSpec((batch, kp), const2),            # act (resident)
            pl.BlockSpec((kp, t3), lambda j: (0, j)),     # streamed weight tile
            pl.BlockSpec((batch, kp), const2),            # act f32 (jaw dot)
            pl.BlockSpec((kp, LANE), const2),             # jaw weights (f32)
            pl.BlockSpec((batch, 3, 3), const3),          # eye_rots^T
            pl.BlockSpec((n_eye, 3), const2),             # left eyeball base
            pl.BlockSpec((n_eye, 3), const2),             # right eyeball base
            pl.BlockSpec((1, 3), const2),                 # left eye transl
            pl.BlockSpec((1, 3), const2),                 # right eye transl
            pl.BlockSpec((n_teeth, 3), const2),           # upper teeth
            pl.BlockSpec((n_teeth, 3), const2),           # lower teeth
        ],
        out_specs=(
            pl.BlockSpec((batch, t3), lambda j: (0, j)),  # head (lane-dense)
            pl.BlockSpec((batch, n_eye, 3), const3),
            pl.BlockSpec((batch, n_eye, 3), const3),
            pl.BlockSpec((batch, n_teeth, 3), const3),
            pl.BlockSpec((batch, n_teeth, 3), const3)),
        compiler_params=pltpu.CompilerParams(
            dimension_semantics=("parallel",),
            vmem_limit_bytes=vmem_limit),
        cost_estimate=cost,
    )(act, packed["w"], act32, packed["wjaw"], rots_t,
      packed["leye"], packed["reye"], packed["ltr"], packed["rtr"],
      packed["tup"], packed["tlo"])

    # Module contract: single concatenated (B, N_total, 3) vertex tensor.
    # TODO(synk): callers that can consume the flat (B, 3N) head + small part
    # tensors directly should skip this lane-sparse relayout/concat.
    head = head_flat[:, :n3].reshape(batch, -1, 3)
    return jnp.concatenate([head, lv, rv, tu, tl], axis=1)


def fuhead_reference(params, identity, expressions, eye_rots):
    """Plain-JAX reference mirroring the PyTorch forward (f32, HIGHEST)."""
    hi = jax.lax.Precision.HIGHEST
    hb = params["m_mean_shape"] + jnp.dot(params["m_id_tensor"], identity, precision=hi)
    transfer = params["m_expr_tensor"] + jnp.tensordot(
        params["m_transfered_iden_tensor"], identity, axes=([2], [0]), precision=hi)
    delta = jnp.dot(expressions, transfer.T, precision=hi)
    batch = expressions.shape[0]
    head = (hb[None, :] + delta).reshape(batch, -1, 3)
    r_t = jnp.swapaxes(eye_rots, -1, -2)
    lv = jnp.matmul(params["left_eyeball_base_verts"], r_t, precision=hi) + params["left_eye_transl"]
    rv = jnp.matmul(params["right_eyeball_base_verts"], r_t, precision=hi) + params["right_eye_transl"]
    n_teeth = params["teeth_upper_verts"].shape[0]
    tu = jnp.broadcast_to(params["teeth_upper_verts"][None], (batch, n_teeth, 3))
    tl = params["teeth_lower_verts"][None] + delta[:, 102:105][:, None, :]
    return jnp.concatenate([head, lv, rv, tu, tl], axis=1)


if __name__ == "__main__":
    # Small synthetic shapes consistent with the module:
    #   num_blend_basis (E) = 63, identity dim I = 16,
    #   N_head = 40 (3*N_head >= 105 for the jaw-delta slice),
    #   10 verts per eyeball, 30 verts per teeth row (15 edge + 15 root).
    B, NUM_ID, NUM_EXPR = 2, 16, 63
    N_HEAD, N_EYE, N_TEETH = 40, 10, 30
    N3 = 3 * N_HEAD

    key = jax.random.PRNGKey(0)
    ks = jax.random.split(key, 12)
    params = {
        "m_mean_shape": jax.random.normal(ks[0], (N3,), jnp.float32) * 0.1,
        "m_id_tensor": jax.random.normal(ks[1], (N3, NUM_ID), jnp.float32) * 0.02,
        "m_expr_tensor": jax.random.normal(ks[2], (N3, NUM_EXPR), jnp.float32) * 0.02,
        "m_transfered_iden_tensor":
            jax.random.normal(ks[3], (N3, NUM_EXPR, NUM_ID), jnp.float32) * 0.01,
        # the *1.2 eyeball scaling of __init__ is folded into the base verts
        "left_eyeball_base_verts": jax.random.normal(ks[4], (N_EYE, 3), jnp.float32) * 0.01 * 1.2,
        "right_eyeball_base_verts": jax.random.normal(ks[5], (N_EYE, 3), jnp.float32) * 0.01 * 1.2,
        "teeth_upper_verts": jax.random.normal(ks[6], (N_TEETH, 3), jnp.float32) * 0.01,
        "teeth_lower_verts": jax.random.normal(ks[7], (N_TEETH, 3), jnp.float32) * 0.01,
        "left_eye_transl": jnp.array([-0.032, 0.029, 0.027], jnp.float32),
        "right_eye_transl": jnp.array([0.032, 0.029, 0.027], jnp.float32),
    }

    identity = jax.random.normal(ks[8], (NUM_ID,), jnp.float32)
    expressions = jax.random.normal(ks[9], (B, NUM_EXPR), jnp.float32) * 0.5
    angles = jnp.array([0.1, -0.2], jnp.float32)
    c, s = jnp.cos(angles), jnp.sin(angles)
    z, o = jnp.zeros_like(c), jnp.ones_like(c)
    eye_rots = jnp.stack([jnp.stack([c, -s, z], axis=-1),
                          jnp.stack([s, c, z], axis=-1),
                          jnp.stack([z, z, o], axis=-1)], axis=1)   # (B, 3, 3)

    expected_shape = (B, N_HEAD + 2 * N_EYE + 2 * N_TEETH, 3)
    ref = fuhead_reference(params, identity, expressions, eye_rots)

    # f32 weight stream (tight check) and bf16 weight stream (roofline config,
    # looser tolerance for the quantized weights).
    for wdt, tol in ((jnp.float32, 5e-3), (jnp.bfloat16, 2e-2)):
        packed, meta = prepare_fuhead_params(params, weight_dtype=wdt)
        out = fuhead_forward(packed, meta, identity, expressions, eye_rots)
        out = jax.block_until_ready(out)
        assert out.shape == expected_shape, (out.shape, expected_shape)
        if not jnp.allclose(out, ref, atol=tol, rtol=tol):
            max_err = float(jnp.max(jnp.abs(out - ref)))
            raise AssertionError(
                f"Pallas output mismatch ({jnp.dtype(wdt).name}), max abs err = {max_err}")

    print("KERNEL_OK")
</pallas_src>

<mosaic_0001>
module attributes {stable_mosaic.version = 11 : i64} {
  func.func @fuhead_kernel(%arg0: i32, %arg1: memref<2x1088xf32, #tpu.memory_space<vmem>>, %arg2: memref<1088x128xf32, #tpu.memory_space<vmem>>, %arg3: memref<2x1088xf32, #tpu.memory_space<vmem>>, %arg4: memref<1088x128xf32, #tpu.memory_space<vmem>>, %arg5: memref<2x3x3xf32, #tpu.memory_space<vmem>>, %arg6: memref<10x3xf32, #tpu.memory_space<vmem>>, %arg7: memref<10x3xf32, #tpu.memory_space<vmem>>, %arg8: memref<1x3xf32, #tpu.memory_space<vmem>>, %arg9: memref<1x3xf32, #tpu.memory_space<vmem>>, %arg10: memref<30x3xf32, #tpu.memory_space<vmem>>, %arg11: memref<30x3xf32, #tpu.memory_space<vmem>>, %arg12: memref<2x128xf32, #tpu.memory_space<vmem>>, %arg13: memref<2x10x3xf32, #tpu.memory_space<vmem>>, %arg14: memref<2x10x3xf32, #tpu.memory_space<vmem>>, %arg15: memref<2x30x3xf32, #tpu.memory_space<vmem>>, %arg16: memref<2x30x3xf32, #tpu.memory_space<vmem>>) attributes {dimension_semantics = [#tpu.dimension_semantics<parallel>], iteration_bounds = array<i64: 1>, scalar_prefetch = 0 : i64, scratch_operands = 0 : i64, tpu.core_type = #tpu.core_type<tc>, window_params = [{pipeline_mode = #tpu.pipeline_mode<synchronous>, transform_indices = @transform_0, window_bounds = array<i64: 2, 1088>}, {transform_indices = @transform_1, window_bounds = array<i64: 1088, 128>}, {pipeline_mode = #tpu.pipeline_mode<synchronous>, transform_indices = @transform_2, window_bounds = array<i64: 2, 1088>}, {pipeline_mode = #tpu.pipeline_mode<synchronous>, transform_indices = @transform_3, window_bounds = array<i64: 1088, 128>}, {pipeline_mode = #tpu.pipeline_mode<synchronous>, transform_indices = @transform_4, window_bounds = array<i64: 2, 3, 3>}, {pipeline_mode = #tpu.pipeline_mode<synchronous>, transform_indices = @transform_5, window_bounds = array<i64: 10, 3>}, {pipeline_mode = #tpu.pipeline_mode<synchronous>, transform_indices = @transform_6, window_bounds = array<i64: 10, 3>}, {pipeline_mode = #tpu.pipeline_mode<synchronous>, transform_indices = @transform_7, window_bounds = array<i64: 1, 3>}, {pipeline_mode = #tpu.pipeline_mode<synchronous>, transform_indices = @transform_8, window_bounds = array<i64: 1, 3>}, {pipeline_mode = #tpu.pipeline_mode<synchronous>, transform_indices = @transform_9, window_bounds = array<i64: 30, 3>}, {pipeline_mode = #tpu.pipeline_mode<synchronous>, transform_indices = @transform_10, window_bounds = array<i64: 30, 3>}, {transform_indices = @transform_11, window_bounds = array<i64: 2, 128>}, {pipeline_mode = #tpu.pipeline_mode<synchronous>, transform_indices = @transform_12, window_bounds = array<i64: 2, 10, 3>}, {pipeline_mode = #tpu.pipeline_mode<synchronous>, transform_indices = @transform_13, window_bounds = array<i64: 2, 10, 3>}, {pipeline_mode = #tpu.pipeline_mode<synchronous>, transform_indices = @transform_14, window_bounds = array<i64: 2, 30, 3>}, {pipeline_mode = #tpu.pipeline_mode<synchronous>, transform_indices = @transform_15, window_bounds = array<i64: 2, 30, 3>}]} {
    %c0 = arith.constant 0 : index
    %c0_0 = arith.constant 0 : index
    %0 = vector.load %arg1[%c0, %c0_0] : memref<2x1088xf32, #tpu.memory_space<vmem>>, vector<2x1088xf32>
    %c0_1 = arith.constant 0 : index
    %c0_2 = arith.constant 0 : index
    %1 = vector.load %arg2[%c0_1, %c0_2] : memref<1088x128xf32, #tpu.memory_space<vmem>>, vector<1088x128xf32>
    %cst = arith.constant dense<0.000000e+00> : vector<2x128xf32>
    %2 = tpu.matmul %0, %1, %cst {dimension_numbers = #tpu.dot_dimension_numbers<[1], [0], [0], [1], [0, 0, 1, 1], [], []>} : vector<2x1088xf32>, vector<1088x128xf32>, vector<2x128xf32> -> vector<2x128xf32>
    %c0_3 = arith.constant 0 : index
    %c0_4 = arith.constant 0 : index
    %3 = vector.load %arg12[%c0_3, %c0_4] : memref<2x128xf32, #tpu.memory_space<vmem>>, vector<2x128xf32>
    tpu.vector_store %arg12[%c0_3, %c0_4], %2 {strides = array<i32>} : memref<2x128xf32, #tpu.memory_space<vmem>>, vector<2x128xf32>,
    %c0_5 = arith.constant 0 : index
    %c0_6 = arith.constant 0 : index
    %4 = vector.load %arg3[%c0_5, %c0_6] : memref<2x1088xf32, #tpu.memory_space<vmem>>, vector<2x1088xf32>
    %c0_7 = arith.constant 0 : index
    %c0_8 = arith.constant 0 : index
    %5 = vector.load %arg4[%c0_7, %c0_8] : memref<1088x128xf32, #tpu.memory_space<vmem>>, vector<1088x128xf32>
    %cst_9 = arith.constant dense<0.000000e+00> : vector<2x128xf32>
    %6 = tpu.matmul %4, %5, %cst_9 {dimension_numbers = #tpu.dot_dimension_numbers<[1], [0], [0], [1], [0, 0, 1, 1], [], []>} : vector<2x1088xf32>, vector<1088x128xf32>, vector<2x128xf32> -> vector<2x128xf32>
    %c0_10 = arith.constant 0 : index
    %c0_11 = arith.constant 0 : index
    %c0_12 = arith.constant 0 : index
    %7 = vector.load %arg5[%c0_10, %c0_11, %c0_12] : memref<2x3x3xf32, #tpu.memory_space<vmem>>, vector<2x3x3xf32>
    %c0_13 = arith.constant 0 : index
    %c0_14 = arith.constant 0 : index
    %8 = vector.load %arg8[%c0_13, %c0_14] : memref<1x3xf32, #tpu.memory_space<vmem>>, vector<1x3xf32>
    %c0_15 = arith.constant 0 : index
    %c0_16 = arith.constant 0 : index
    %9 = vector.load %arg9[%c0_15, %c0_16] : memref<1x3xf32, #tpu.memory_space<vmem>>, vector<1x3xf32>
    %c0_17 = arith.constant 0 : index
    %c0_18 = arith.constant 0 : index
    %10 = vector.load %arg10[%c0_17, %c0_18] : memref<30x3xf32, #tpu.memory_space<vmem>>, vector<30x3xf32>
    %c0_19 = arith.constant 0 : index
    %c0_20 = arith.constant 0 : index
    %11 = vector.load %arg11[%c0_19, %c0_20] : memref<30x3xf32, #tpu.memory_space<vmem>>, vector<30x3xf32>
    %c0_21 = arith.constant 0 : index
    %c0_22 = arith.constant 0 : index
    %12 = vector.load %arg6[%c0_21, %c0_22] : memref<10x3xf32, #tpu.memory_space<vmem>>, vector<10x3xf32>
    %13 = vector.extract_strided_slice %12 {offsets = [0, 0], sizes = [10, 1], strides = [1, 1]} : vector<10x3xf32> to vector<10x1xf32>
    %14 = vector.shape_cast %13 : vector<10x1xf32> to vector<1x10x1xf32>
    %15 = vector.extract_strided_slice %7 {offsets = [0, 0, 0], sizes = [2, 1, 3], strides = [1, 1, 1]} : vector<2x3x3xf32> to vector<2x1x3xf32>
    %16 = vector.broadcast %14 : vector<1x10x1xf32> to vector<2x10x3xf32>
    %17 = vector.broadcast %15 : vector<2x1x3xf32> to vector<2x10x3xf32>
    %18 = arith.mulf %16, %17 : vector<2x10x3xf32>
    %19 = vector.extract_strided_slice %12 {offsets = [0, 1], sizes = [10, 1], strides = [1, 1]} : vector<10x3xf32> to vector<10x1xf32>
    %20 = vector.shape_cast %19 : vector<10x1xf32> to vector<1x10x1xf32>
    %21 = vector.extract_strided_slice %7 {offsets = [0, 1, 0], sizes = [2, 1, 3], strides = [1, 1, 1]} : vector<2x3x3xf32> to vector<2x1x3xf32>
    %22 = vector.broadcast %20 : vector<1x10x1xf32> to vector<2x10x3xf32>
    %23 = vector.broadcast %21 : vector<2x1x3xf32> to vector<2x10x3xf32>
    %24 = arith.mulf %22, %23 : vector<2x10x3xf32>
    %25 = arith.addf %18, %24 : vector<2x10x3xf32>
    %26 = vector.extract_strided_slice %12 {offsets = [0, 2], sizes = [10, 1], strides = [1, 1]} : vector<10x3xf32> to vector<10x1xf32>
    %27 = vector.shape_cast %26 : vector<10x1xf32> to vector<1x10x1xf32>
    %28 = vector.extract_strided_slice %7 {offsets = [0, 2, 0], sizes = [2, 1, 3], strides = [1, 1, 1]} : vector<2x3x3xf32> to vector<2x1x3xf32>
    %29 = vector.broadcast %27 : vector<1x10x1xf32> to vector<2x10x3xf32>
    %30 = vector.broadcast %28 : vector<2x1x3xf32> to vector<2x10x3xf32>
    %31 = arith.mulf %29, %30 : vector<2x10x3xf32>
    %32 = arith.addf %25, %31 : vector<2x10x3xf32>
    %33 = vector.shape_cast %8 : vector<1x3xf32> to vector<1x1x3xf32>
    %34 = vector.broadcast %33 : vector<1x1x3xf32> to vector<2x10x3xf32>
    %35 = arith.addf %32, %34 : vector<2x10x3xf32>
    %c0_23 = arith.constant 0 : index
    %c0_24 = arith.constant 0 : index
    %c0_25 = arith.constant 0 : index
    %36 = vector.load %arg13[%c0_23, %c0_24, %c0_25] : memref<2x10x3xf32, #tpu.memory_space<vmem>>, vector<2x10x3xf32>
    tpu.vector_store %arg13[%c0_23, %c0_24, %c0_25], %35 {strides = array<i32>} : memref<2x10x3xf32, #tpu.memory_space<vmem>>, vector<2x10x3xf32>,
    %c0_26 = arith.constant 0 : index
    %c0_27 = arith.constant 0 : index
    %37 = vector.load %arg7[%c0_26, %c0_27] : memref<10x3xf32, #tpu.memory_space<vmem>>, vector<10x3xf32>
    %38 = vector.extract_strided_slice %37 {offsets = [0, 0], sizes = [10, 1], strides = [1, 1]} : vector<10x3xf32> to vector<10x1xf32>
    %39 = vector.shape_cast %38 : vector<10x1xf32> to vector<1x10x1xf32>
    %40 = vector.extract_strided_slice %7 {offsets = [0, 0, 0], sizes = [2, 1, 3], strides = [1, 1, 1]} : vector<2x3x3xf32> to vector<2x1x3xf32>
    %41 = vector.broadcast %39 : vector<1x10x1xf32> to vector<2x10x3xf32>
    %42 = vector.broadcast %40 : vector<2x1x3xf32> to vector<2x10x3xf32>
    %43 = arith.mulf %41, %42 : vector<2x10x3xf32>
    %44 = vector.extract_strided_slice %37 {offsets = [0, 1], sizes = [10, 1], strides = [1, 1]} : vector<10x3xf32> to vector<10x1xf32>
    %45 = vector.shape_cast %44 : vector<10x1xf32> to vector<1x10x1xf32>
    %46 = vector.extract_strided_slice %7 {offsets = [0, 1, 0], sizes = [2, 1, 3], strides = [1, 1, 1]} : vector<2x3x3xf32> to vector<2x1x3xf32>
    %47 = vector.broadcast %45 : vector<1x10x1xf32> to vector<2x10x3xf32>
    %48 = vector.broadcast %46 : vector<2x1x3xf32> to vector<2x10x3xf32>
    %49 = arith.mulf %47, %48 : vector<2x10x3xf32>
    %50 = arith.addf %43, %49 : vector<2x10x3xf32>
    %51 = vector.extract_strided_slice %37 {offsets = [0, 2], sizes = [10, 1], strides = [1, 1]} : vector<10x3xf32> to vector<10x1xf32>
    %52 = vector.shape_cast %51 : vector<10x1xf32> to vector<1x10x1xf32>
    %53 = vector.extract_strided_slice %7 {offsets = [0, 2, 0], sizes = [2, 1, 3], strides = [1, 1, 1]} : vector<2x3x3xf32> to vector<2x1x3xf32>
    %54 = vector.broadcast %52 : vector<1x10x1xf32> to vector<2x10x3xf32>
    %55 = vector.broadcast %53 : vector<2x1x3xf32> to vector<2x10x3xf32>
    %56 = arith.mulf %54, %55 : vector<2x10x3xf32>
    %57 = arith.addf %50, %56 : vector<2x10x3xf32>
    %58 = vector.shape_cast %9 : vector<1x3xf32> to vector<1x1x3xf32>
    %59 = vector.broadcast %58 : vector<1x1x3xf32> to vector<2x10x3xf32>
    %60 = arith.addf %57, %59 : vector<2x10x3xf32>
    %c0_28 = arith.constant 0 : index
    %c0_29 = arith.constant 0 : index
    %c0_30 = arith.constant 0 : index
    %61 = vector.load %arg14[%c0_28, %c0_29, %c0_30] : memref<2x10x3xf32, #tpu.memory_space<vmem>>, vector<2x10x3xf32>
    tpu.vector_store %arg14[%c0_28, %c0_29, %c0_30], %60 {strides = array<i32>} : memref<2x10x3xf32, #tpu.memory_space<vmem>>, vector<2x10x3xf32>,
    %62 = vector.shape_cast %10 : vector<30x3xf32> to vector<1x30x3xf32>
    %63 = vector.shape_cast %62 : vector<1x30x3xf32> to vector<1x30x3xf32>
    %64 = vector.broadcast %63 : vector<1x30x3xf32> to vector<2x30x3xf32>
    %c0_31 = arith.constant 0 : index
    %c0_32 = arith.constant 0 : index
    %c0_33 = arith.constant 0 : index
    %65 = vector.load %arg15[%c0_31, %c0_32, %c0_33] : memref<2x30x3xf32, #tpu.memory_space<vmem>>, vector<2x30x3xf32>
    tpu.vector_store %arg15[%c0_31, %c0_32, %c0_33], %64 {strides = array<i32>} : memref<2x30x3xf32, #tpu.memory_space<vmem>>, vector<2x30x3xf32>,
    %66 = vector.shape_cast %11 : vector<30x3xf32> to vector<1x30x3xf32>
    %67 = vector.extract_strided_slice %6 {offsets = [0, 0], sizes = [2, 3], strides = [1, 1]} : vector<2x128xf32> to vector<2x3xf32>
    %68 = vector.shape_cast %67 : vector<2x3xf32> to vector<2x1x3xf32>
    %69 = vector.broadcast %66 : vector<1x30x3xf32> to vector<2x30x3xf32>
    %70 = vector.broadcast %68 : vector<2x1x3xf32> to vector<2x30x3xf32>
    %71 = arith.addf %69, %70 : vector<2x30x3xf32>
    %c0_34 = arith.constant 0 : index
    %c0_35 = arith.constant 0 : index
    %c0_36 = arith.constant 0 : index
    %72 = vector.load %arg16[%c0_34, %c0_35, %c0_36] : memref<2x30x3xf32, #tpu.memory_space<vmem>>, vector<2x30x3xf32>
    tpu.vector_store %arg16[%c0_34, %c0_35, %c0_36], %71 {strides = array<i32>} : memref<2x30x3xf32, #tpu.memory_space<vmem>>, vector<2x30x3xf32>,
    return
  }
  func.func @transform_0(%arg0: i32) -> (i32, i32) {
    %c0_i32 = arith.constant 0 : i32
    %c0_i32_0 = arith.constant 0 : i32
    %c0_i32_1 = arith.constant 0 : i32
    return %c0_i32, %c0_i32_0 : i32, i32
  }
  func.func @transform_1(%arg0: i32) -> (i32, i32) {
    %c0_i32 = arith.constant 0 : i32
    %c0_i32_0 = arith.constant 0 : i32
    return %c0_i32, %arg0 : i32, i32
  }
  func.func @transform_2(%arg0: i32) -> (i32, i32) {
    %c0_i32 = arith.constant 0 : i32
    %c0_i32_0 = arith.constant 0 : i32
    %c0_i32_1 = arith.constant 0 : i32
    return %c0_i32, %c0_i32_0 : i32, i32
  }
  func.func @transform_3(%arg0: i32) -> (i32, i32) {
    %c0_i32 = arith.constant 0 : i32
    %c0_i32_0 = arith.constant 0 : i32
    %c0_i32_1 = arith.constant 0 : i32
    return %c0_i32, %c0_i32_0 : i32, i32
  }
  func.func @transform_4(%arg0: i32) -> (i32, i32, i32) {
    %c0_i32 = arith.constant 0 : i32
    %c0_i32_0 = arith.constant 0 : i32
    %c0_i32_1 = arith.constant 0 : i32
    %c0_i32_2 = arith.constant 0 : i32
    return %c0_i32, %c0_i32_0, %c0_i32_1 : i32, i32, i32
  }
  func.func @transform_5(%arg0: i32) -> (i32, i32) {
    %c0_i32 = arith.constant 0 : i32
    %c0_i32_0 = arith.constant 0 : i32
    %c0_i32_1 = arith.constant 0 : i32
    return %c0_i32, %c0_i32_0 : i32, i32
  }
  func.func @transform_6(%arg0: i32) -> (i32, i32) {
    %c0_i32 = arith.constant 0 : i32
    %c0_i32_0 = arith.constant 0 : i32
    %c0_i32_1 = arith.constant 0 : i32
    return %c0_i32, %c0_i32_0 : i32, i32
  }
  func.func @transform_7(%arg0: i32) -> (i32, i32) {
    %c0_i32 = arith.constant 0 : i32
    %c0_i32_0 = arith.constant 0 : i32
    %c0_i32_1 = arith.constant 0 : i32
    return %c0_i32, %c0_i32_0 : i32, i32
  }
  func.func @transform_8(%arg0: i32) -> (i32, i32) {
    %c0_i32 = arith.constant 0 : i32
    %c0_i32_0 = arith.constant 0 : i32
    %c0_i32_1 = arith.constant 0 : i32
    return %c0_i32, %c0_i32_0 : i32, i32
  }
  func.func @transform_9(%arg0: i32) -> (i32, i32) {
    %c0_i32 = arith.constant 0 : i32
    %c0_i32_0 = arith.constant 0 : i32
    %c0_i32_1 = arith.constant 0 : i32
    return %c0_i32, %c0_i32_0 : i32, i32
  }
  func.func @transform_10(%arg0: i32) -> (i32, i32) {
    %c0_i32 = arith.constant 0 : i32
    %c0_i32_0 = arith.constant 0 : i32
    %c0_i32_1 = arith.constant 0 : i32
    return %c0_i32, %c0_i32_0 : i32, i32
  }
  func.func @transform_11(%arg0: i32) -> (i32, i32) {
    %c0_i32 = arith.constant 0 : i32
    %c0_i32_0 = arith.constant 0 : i32
    return %c0_i32, %arg0 : i32, i32
  }
  func.func @transform_12(%arg0: i32) -> (i32, i32, i32) {
    %c0_i32 = arith.constant 0 : i32
    %c0_i32_0 = arith.constant 0 : i32
    %c0_i32_1 = arith.constant 0 : i32
    %c0_i32_2 = arith.constant 0 : i32
    return %c0_i32, %c0_i32_0, %c0_i32_1 : i32, i32, i32
  }
  func.func @transform_13(%arg0: i32) -> (i32, i32, i32) {
    %c0_i32 = arith.constant 0 : i32
    %c0_i32_0 = arith.constant 0 : i32
    %c0_i32_1 = arith.constant 0 : i32
    %c0_i32_2 = arith.constant 0 : i32
    return %c0_i32, %c0_i32_0, %c0_i32_1 : i32, i32, i32
  }
  func.func @transform_14(%arg0: i32) -> (i32, i32, i32) {
    %c0_i32 = arith.constant 0 : i32
    %c0_i32_0 = arith.constant 0 : i32
    %c0_i32_1 = arith.constant 0 : i32
    %c0_i32_2 = arith.constant 0 : i32
    return %c0_i32, %c0_i32_0, %c0_i32_1 : i32, i32, i32
  }
  func.func @transform_15(%arg0: i32) -> (i32, i32, i32) {
    %c0_i32 = arith.constant 0 : i32
    %c0_i32_0 = arith.constant 0 : i32
    %c0_i32_1 = arith.constant 0 : i32
    %c0_i32_2 = arith.constant 0 : i32
    return %c0_i32, %c0_i32_0, %c0_i32_1 : i32, i32, i32
  }
}

</mosaic_0001>

<bundles_post_ra>
// kernel: tpu_custom_call.1
= control target key start
LH: loop header
LB: loop body
LE: loop exit
PB: predicated region body
PF: predicated region fallthrough
CT: control target
= control target key end

     0   :  { %21 = vsyncpa [#allocation3], 0  ;;  %s2518_s0 = inlined_call_operand.vmem [shape: f32[2,1088], index: 0, kind: input, shape index: {}]   ;;  %s2519_s1 = inlined_call_operand.hbm [shape: f32[1088,128], index: 1, kind: input, shape index: {}]   ;;  %s2520_s2 = inlined_call_operand.vmem [shape: f32[2,1088], index: 2, kind: input, shape index: {}]   ;;  %s2521_s3 = inlined_call_operand.hbm [shape: f32[1088,128], index: 3, kind: input, shape index: {}]   ;;  %s2522_s4 = inlined_call_operand.vmem [shape: f32[2,3,3], index: 4, kind: input, shape index: {}]   ;;  %s2523_s5 = inlined_call_operand.vmem [shape: f32[10,3], index: 5, kind: input, shape index: {}]   ;;  %s2524_s6 = inlined_call_operand.vmem [shape: f32[10,3], index: 6, kind: input, shape index: {}]   ;;  %s2525_s7 = inlined_call_operand.vmem [shape: f32[1,3], index: 7, kind: input, shape index: {}]   ;;  %s2526_s8 = inlined_call_operand.vmem [shape: f32[1,3], index: 8, kind: input, shape index: {}]   ;;  %s2527_s9 = inlined_call_operand.vmem [shape: f32[30,3], index: 9, kind: input, shape index: {}]   ;;  %s2528_s10 = inlined_call_operand.vmem [shape: f32[30,3], index: 10, kind: input, shape index: {}]   ;;  %s2529_s11 = inlined_call_operand.hbm [shape: f32[2,128], index: 11, kind: output, shape index: {0}]   ;;  %s2530_s12 = inlined_call_operand.vmem [shape: f32[2,10,3], index: 12, kind: output, shape index: {1}]   ;;  %s2531_s13 = inlined_call_operand.vmem [shape: f32[2,10,3], index: 13, kind: output, shape index: {2}]   ;;  %s2532_s14 = inlined_call_operand.vmem [shape: f32[2,30,3], index: 14, kind: output, shape index: {3}]   ;;  %s2533_s15 = inlined_call_operand.vmem [shape: f32[2,30,3], index: 15, kind: output, shape index: {4}]  }
   0x1   :  { %22 = vsyncpa [#allocation6], 0 }
   0x2   :  { %23 = vsyncpa [#allocation4], 0  ;;  %s2130_s18 = smov [#allocation2]   ;;  %s2058_s22 = scalar_lea.hbm %s2519_s1, 17408 }
   0x3   :  { %s31_s19 = sshll.u32 %s2130_s18, 4  ;;  %p2059_p0 = scmp.ne.s32.totalorder %s2519_s1, %s2058_s22  ;;  %s32_s19 = int_to_ptr.vmem [resolvable:$true] %s31_s19 }
   0x4   :  { %p2062_p1 = scmp.lt.u32.totalorder %s2058_s22, %s2519_s1 }
   0x6   :  { %p2064_p2 = pnand %p2062_p1, %p2059_p0 }
   0x8   :  { %2067 = shalt.err (!%p2064_p2)
}
   0x9   :  { %s2068_s27 = scalar_lea.vmem %s32_s19, 17408  ;;  %p2073_p4 = scmp.lt.s32.totalorder %s32_s19, %s32_s19 }
   0xa   :  { %p2069_p3 = scmp.ne.s32.totalorder %s32_s19, %s2068_s27  ;;  %p2074_p5 = scmp.lt.s32.totalorder %s2068_s27, %s2068_s27 }
   0xc   :  { %p2075_p6 = por %p2074_p5, %p2073_p4 }
   0xe   :  { %p2076_p7 = pnand %p2075_p6, %p2069_p3 }
  0x10   :  { %2079 = shalt.err (!%p2076_p7)
}
  0x11   :  { %s2131_s28 = smov 128   ;;  %s2132_s29 = smov 8  }
  0x12   :  { %37 = dma.hbm_to_vmem [thread:$0]  %s2519_s1, 17408, %s32_s19, [#allocation3], %s2131_s28, %s2131_s28, %s2132_s29  }
  0x13   :  { %s2133_s17 = smov [#allocation5]   ;;  %s2080_s22 = scalar_lea.hbm %s2521_s3, 17408 }
  0x14   :  { %s45_s18 = sshll.u32 %s2133_s17, 4  ;;  %p2081_p8 = scmp.ne.s32.totalorder %s2521_s3, %s2080_s22  ;;  %s46_s18 = int_to_ptr.vmem [resolvable:$true] %s45_s18 }
  0x15   :  { %p2084_p9 = scmp.lt.u32.totalorder %s2080_s22, %s2521_s3 }
  0x17   :  { %p2086_p10 = pnand %p2084_p9, %p2081_p8 }
  0x19   :  { %2089 = shalt.err (!%p2086_p10)
}
  0x1a   :  { %s2090_s27 = scalar_lea.vmem %s46_s18, 17408  ;;  %p2095_p12 = scmp.lt.s32.totalorder %s46_s18, %s46_s18 }
  0x1b   :  { %p2091_p11 = scmp.ne.s32.totalorder %s46_s18, %s2090_s27  ;;  %p2096_p13 = scmp.lt.s32.totalorder %s2090_s27, %s2090_s27 }
  0x1d   :  { %p2097_p0 = por %p2096_p13, %p2095_p12 }
  0x1f   :  { %p2098_p1 = pnand %p2097_p0, %p2091_p11 }
  0x21   :  { %2101 = shalt.err (!%p2098_p1)
}
  0x22   :  { %51 = dma.hbm_to_vmem [thread:$0]  %s2521_s3, 17408, %s46_s18, [#allocation6], %s2131_s28, %s2131_s28, %s2132_s29  }
  0x23   :  { %2124 = dma.done.wait [#allocation3], 17408  }
  0x24   :  { %2125 = vsyncadd [#allocation3], 4294949888 }
  0x25   :  { %2126 = dma.done.wait [#allocation6], 17408  }
  0x26   :  { %2127 = vsyncadd [#allocation6], 4294949888  ;;  %v91_v0 = vld [vmem:[#allocation2 + $0x80] sm:$0xff]  ;;  %v92_v1 = vld [vmem:[#allocation2 + $0x88] sm:$0xff]  ;;  %v2134_v47 = vmov 1983009808   ;;  %v218_v49 = vlaneseq }
  0x27   :  { %v123_v2 = vld [vmem:[#allocation2 + $0x180] sm:$0xff]  ;;  %v1754_v3 = vpack.c.bf16 %v92_v1, %v91_v0  ;;  %v124_v4 = vld [vmem:[#allocation2 + $0x188] sm:$0xff]  ;;  %v93_v11 = vld [vmem:[#allocation2 + $0x90] sm:$0xff]  ;;  %v216_v48 = vunpack.c.l.s4 %v2134_v47  ;;  %vm2138_vm0 = vmmov 0   ;;  %vm263_vm1 = vcmask 523264   ;;  %s2141_s3 = smov [#allocation7]  }
  0x28   :  { %v75_v5 = vld [vmem:[#allocation2] sm:$0xff]  ;;  %v76_v6 = vld [vmem:[#allocation2 + $0x8] sm:$0xff]  ;;  %v1786_v7 = vpack.c.bf16 %v124_v4, %v123_v2  ;;  %v94_v13 = vld [vmem:[#allocation2 + $0x98] sm:$0xff]  ;;  %v2247_v0 = vshrl.u32 %v218_v49, 7  ;;  %vm1254_vm2 = vcmask 23552   ;;  %vm1325_vm3 = vcmask 21504  }
  0x29   :  { %v1756_v8 = vpack.c.bf16 %v76_v6, %v75_v5  ;;  %v107_v9 = vld [vmem:[#allocation2 + $0x100] sm:$0xff]  ;;  %v108_v10 = vld [vmem:[#allocation2 + $0x108] sm:$0xff]  ;;  %1755 = vmatprep.subr.bf16.mxu0 %v1754_v3  ;;  %v125_v14 = vld [vmem:[#allocation2 + $0x190] sm:$0xff]  ;;  %v1758_v16 = vpack.c.bf16 %v94_v13, %v93_v11  ;;  %v217_v63 = vunpack.c.0.s8 %v216_v48  ;;  %vm1256_vm4 = vcmask 17408   ;;  %s1386_s28 = sshll.u32 %s2141_s3, 4  ;;  %s1387_s28 = int_to_ptr.vmem [resolvable:$true] %s1386_s28 }
  0x2a   :  { %v1788_v12 = vpack.c.bf16 %v108_v10, %v107_v9  ;;  %v126_v15 = vld [vmem:[#allocation2 + $0x198] sm:$0xff]  ;;  %1787 = vmatprep.subr.bf16.mxu1 %v1786_v7  ;;  %v77_v18 = vld [vmem:[#allocation2 + $0x10] sm:$0xff]  ;;  %v95_v23 = vld [vmem:[#allocation2 + $0xa0] sm:$0xff]  ;;  %s2102_s29 = scalar_lea.vmem %s1387_s28, 32  ;;  %p2107_p3 = scmp.lt.s32.totalorder %s1387_s28, %s1387_s28 }
  0x2b   :  { %1757 = vmatpush3.bf16.msra.mxu0 %v1756_v8  ;;  %v1790_v17 = vpack.c.bf16 %v126_v15, %v125_v14  ;;  %v78_v19 = vld [vmem:[#allocation2 + $0x18] sm:$0xff]  ;;  %v109_v20 = vld [vmem:[#allocation2 + $0x110] sm:$0xff]  ;;  %v96_v24 = vld [vmem:[#allocation2 + $0xa8] sm:$0xff]  ;;  %v2250_v13 = vsub.s32 %v217_v63, %v2247_v0  ;;  %p2103_p2 = scmp.ne.s32.totalorder %s1387_s28, %s2102_s29  ;;  %p2108_p4 = scmp.lt.s32.totalorder %s2102_s29, %s2102_s29 }
  0x2c   :  { %1789 = vmatpush3.bf16.msra.mxu1 %v1788_v12  ;;  %v1760_v21 = vpack.c.bf16 %v78_v19, %v77_v18  ;;  %v110_v22 = vld [vmem:[#allocation2 + $0x118] sm:$0xff]  ;;  %1759 = vmatprep.subr.bf16.mxu0 %v1758_v16  ;;  %v1762_v26 = vpack.c.bf16 %v96_v24, %v95_v23  ;;  %v127_v27 = vld [vmem:[#allocation2 + $0x1a0] sm:$0xff]  ;;  %v128_v28 = vld [vmem:[#allocation2 + $0x1a8] sm:$0xff] }
  0x2d   :  { %1791 = vmatprep.subr.bf16.mxu1 %v1790_v17  ;;  %v1792_v25 = vpack.c.bf16 %v110_v22, %v109_v20  ;;  %v79_v29 = vld [vmem:[#allocation2 + $0x20] sm:$0xff]  ;;  %v1794_v30 = vpack.c.bf16 %v128_v28, %v127_v27  ;;  %v80_v31 = vld [vmem:[#allocation2 + $0x28] sm:$0xff]  ;;  %v97_v35 = vld [vmem:[#allocation2 + $0xb0] sm:$0xff]  ;;  %p2109_p5 = por %p2108_p4, %p2107_p3 }
  0x2e   :  { %v111_v32 = vld [vmem:[#allocation2 + $0x120] sm:$0xff]  ;;  %v112_v33 = vld [vmem:[#allocation2 + $0x128] sm:$0xff]  ;;  %v1764_v34 = vpack.c.bf16 %v80_v31, %v79_v29  ;;  %v98_v36 = vld [vmem:[#allocation2 + $0xb8] sm:$0xff]  ;;  %v2135_v29 = vmov 1  }
  0x2f   :  { %1761 = vmatpush3.bf16.msra.mxu0 %v1760_v21  ;;  %v129_v37 = vld [vmem:[#allocation2 + $0x1b0] sm:$0xff]  ;;  %v1796_v38 = vpack.c.bf16 %v112_v33, %v111_v32  ;;  %v1766_v39 = vpack.c.bf16 %v98_v36, %v97_v35  ;;  %v130_v40 = vld [vmem:[#allocation2 + $0x1b8] sm:$0xff]  ;;  %v99_v46 = vld [vmem:[#allocation2 + $0xc0] sm:$0xff]  ;;  %2048 = vset.pattern.permute.xlu1 %v2135_v29  ;;  %v2136_v32 = vmov 0   ;;  %p2110_p6 = pnand %p2109_p5, %p2103_p2 }
  0x30   :  { %1793 = vmatpush3.bf16.msra.mxu1 %v1792_v25  ;;  %1763 = vmatprep.subr.bf16.mxu0 %v1762_v26  ;;  %v81_v41 = vld [vmem:[#allocation2 + $0x30] sm:$0xff]  ;;  %v82_v42 = vld [vmem:[#allocation2 + $0x38] sm:$0xff]  ;;  %v1798_v43 = vpack.c.bf16 %v130_v40, %v129_v37  ;;  %v100_v50 = vld [vmem:[#allocation2 + $0xc8] sm:$0xff] }
  0x31   :  { %1795 = vmatprep.subr.bf16.mxu1 %v1794_v30  ;;  %v113_v44 = vld [vmem:[#allocation2 + $0x130] sm:$0xff]  ;;  %v114_v45 = vld [vmem:[#allocation2 + $0x138] sm:$0xff]  ;;  %v131_v51 = vld [vmem:[#allocation2 + $0x1c0] sm:$0xff]  ;;  %v1768_v53 = vpack.c.bf16 %v82_v42, %v81_v41  ;;  %v1770_v55 = vpack.c.bf16 %v100_v50, %v99_v46  ;;  %2047 = vset.pattern.permute.xlu0 %v2136_v32 }
  0x32   :  { %v132_v52 = vld [vmem:[#allocation2 + $0x1c8] sm:$0xff]  ;;  %v1800_v54 = vpack.c.bf16 %v114_v45, %v113_v44  ;;  %v83_v56 = vld [vmem:[#allocation2 + $0x40] sm:$0xff]  ;;  %v101_v61 = vld [vmem:[#allocation2 + $0xd0] sm:$0xff] }
  0x33   :  { %1765 = vmatpush3.bf16.msra.mxu0 %v1764_v34  ;;  %v84_v57 = vld [vmem:[#allocation2 + $0x48] sm:$0xff]  ;;  %v115_v58 = vld [vmem:[#allocation2 + $0x140] sm:$0xff]  ;;  %v1802_v59 = vpack.c.bf16 %v132_v52, %v131_v51  ;;  %v102_v62 = vld [vmem:[#allocation2 + $0xd8] sm:$0xff] }
  0x34   :  { %1797 = vmatpush3.bf16.msra.mxu1 %v1796_v38  ;;  %1767 = vmatprep.subr.bf16.mxu0 %v1766_v39  ;;  %v116_v60 = vld [vmem:[#allocation2 + $0x148] sm:$0xff]  ;;  %v133_v1 = vld [vmem:[#allocation2 + $0x1d0] sm:$0xff]  ;;  %v134_v2 = vld [vmem:[#allocation2 + $0x1d8] sm:$0xff]  ;;  %v1772_v3 = vpack.c.bf16 %v84_v57, %v83_v56  ;;  %v1774_v5 = vpack.c.bf16 %v102_v62, %v101_v61 }
  0x35   :  { %1799 = vmatprep.subr.bf16.mxu1 %v1798_v43  ;;  %v1804_v4 = vpack.c.bf16 %v116_v60, %v115_v58  ;;  %v85_v6 = vld [vmem:[#allocation2 + $0x50] sm:$0xff]  ;;  %v86_v7 = vld [vmem:[#allocation2 + $0x58] sm:$0xff]  ;;  %v1806_v9 = vpack.c.bf16 %v134_v2, %v133_v1  ;;  %v103_v11 = vld [vmem:[#allocation2 + $0xe0] sm:$0xff] }
  0x36   :  { %v117_v8 = vld [vmem:[#allocation2 + $0x150] sm:$0xff]  ;;  %v118_v10 = vld [vmem:[#allocation2 + $0x158] sm:$0xff]  ;;  %v104_v12 = vld [vmem:[#allocation2 + $0xe8] sm:$0xff]  ;;  %v1776_v16 = vpack.c.bf16 %v86_v7, %v85_v6 }
  0x37   :  { %1769 = vmatpush3.bf16.msra.mxu0 %v1768_v53  ;;  %v135_v14 = vld [vmem:[#allocation2 + $0x1e0] sm:$0xff]  ;;  %v136_v15 = vld [vmem:[#allocation2 + $0x1e8] sm:$0xff]  ;;  %v1808_v18 = vpack.c.bf16 %v118_v10, %v117_v8  ;;  %v1778_v19 = vpack.c.bf16 %v104_v12, %v103_v11  ;;  %v105_v25 = vld [vmem:[#allocation2 + $0xf0] sm:$0xff] }
  0x38   :  { %1801 = vmatpush3.bf16.msra.mxu1 %v1800_v54  ;;  %1771 = vmatprep.subr.bf16.mxu0 %v1770_v55  ;;  %v87_v17 = vld [vmem:[#allocation2 + $0x60] sm:$0xff]  ;;  %v88_v20 = vld [vmem:[#allocation2 + $0x68] sm:$0xff]  ;;  %v1810_v23 = vpack.c.bf16 %v136_v15, %v135_v14  ;;  %v106_v26 = vld [vmem:[#allocation2 + $0xf8] sm:$0xff] }
  0x39   :  { %1803 = vmatprep.subr.bf16.mxu1 %v1802_v59  ;;  %v119_v21 = vld [vmem:[#allocation2 + $0x160] sm:$0xff]  ;;  %v120_v24 = vld [vmem:[#allocation2 + $0x168] sm:$0xff]  ;;  %v137_v30 = vld [vmem:[#allocation2 + $0x1f0] sm:$0xff]  ;;  %v1780_v33 = vpack.c.bf16 %v88_v20, %v87_v17  ;;  %v1782_v37 = vpack.c.bf16 %v106_v26, %v105_v25 }
  0x3a   :  { %v72_v22 = vld [vmem:[%s2518_s0] sm:$0xff]  ;;  %v138_v31 = vld [vmem:[#allocation2 + $0x1f8] sm:$0xff]  ;;  %v1812_v36 = vpack.c.bf16 %v120_v24, %v119_v21  ;;  %v89_v38 = vld [vmem:[#allocation2 + $0x70] sm:$0xff] }
  0x3b   :  { %1773 = vmatpush3.bf16.msra.mxu0 %v1772_v3  ;;  %v221_v27 = vrot.slane %v72_v22, %v2250_v13  ;;  %v214_v28 = vcombine.high %v72_v22, %v72_v22  ;;  %v90_v39 = vld [vmem:[#allocation2 + $0x78] sm:$0xff]  ;;  %v121_v40 = vld [vmem:[#allocation2 + $0x170] sm:$0xff]  ;;  %v1814_v41 = vpack.c.bf16 %v138_v31, %v137_v30  ;;  %v155_v44 = vld [vmem:[#allocation2 + $0x280] sm:$0xff] }
  0x3c   :  { %1805 = vmatpush3.bf16.msra.mxu1 %v1804_v4  ;;  %1775 = vmatprep.subr.bf16.mxu0 %v1774_v5  ;;  %v122_v42 = vld [vmem:[#allocation2 + $0x178] sm:$0xff]  ;;  %v156_v45 = vld [vmem:[#allocation2 + $0x288] sm:$0xff]  ;;  %v187_v46 = vld [vmem:[#allocation2 + $0x380] sm:$0xff]  ;;  %v1784_v48 = vpack.c.bf16 %v90_v39, %v89_v38 }
  0x3d   :  { %1807 = vmatprep.subr.bf16.mxu1 %v1806_v9  ;;  %v229_v34 = vcombine.high %v221_v27, %v221_v27  ;;  %v228_v35 = vrot.slane %v214_v28, %v2250_v13  ;;  %v188_v47 = vld [vmem:[#allocation2 + $0x388] sm:$0xff]  ;;  %v1816_v49 = vpack.c.bf16 %v122_v42, %v121_v40  ;;  %v1818_v50 = vpack.c.bf16 %v156_v45, %v155_v44  ;;  %v139_v51 = vld [vmem:[#allocation2 + $0x200] sm:$0xff]  ;;  %v157_v56 = vld [vmem:[#allocation2 + $0x290] sm:$0xff] }
  0x3e   :  { %v140_v52 = vld [vmem:[#allocation2 + $0x208] sm:$0xff]  ;;  %v171_v53 = vld [vmem:[#allocation2 + $0x300] sm:$0xff]  ;;  %v1850_v54 = vpack.c.bf16 %v188_v47, %v187_v46  ;;  %v158_v57 = vld [vmem:[#allocation2 + $0x298] sm:$0xff] }
  0x3f   :  { %1777 = vmatpush3.bf16.msra.mxu0 %v1776_v16  ;;  %330 = vmatprep.mubr.f32.mxu0 %v229_v34  ;;  %v230_v43 = vcombine.high %v228_v35, %v228_v35  ;;  %v172_v55 = vld [vmem:[#allocation2 + $0x308] sm:$0xff]  ;;  %v189_v58 = vld [vmem:[#allocation2 + $0x390] sm:$0xff]  ;;  %v190_v59 = vld [vmem:[#allocation2 + $0x398] sm:$0xff]  ;;  %v1820_v60 = vpack.c.bf16 %v140_v52, %v139_v51  ;;  %v1822_v62 = vpack.c.bf16 %v158_v57, %v157_v56 }
  0x40   :  { %1809 = vmatpush3.bf16.msra.mxu1 %v1808_v18  ;;  %1779 = vmatprep.subr.bf16.mxu0 %v1778_v19  ;;  %v1852_v61 = vpack.c.bf16 %v172_v55, %v171_v53  ;;  %v141_v63 = vld [vmem:[#allocation2 + $0x210] sm:$0xff]  ;;  %v142_v1 = vld [vmem:[#allocation2 + $0x218] sm:$0xff]  ;;  %v1854_v3 = vpack.c.bf16 %v190_v59, %v189_v58  ;;  %v159_v5 = vld [vmem:[#allocation2 + $0x2a0] sm:$0xff] }
  0x41   :  { %1811 = vmatprep.subr.bf16.mxu1 %v1810_v23  ;;  %400 = vmatprep.mubr.f32.mxu1 %v230_v43  ;;  %v173_v2 = vld [vmem:[#allocation2 + $0x310] sm:$0xff]  ;;  %v174_v4 = vld [vmem:[#allocation2 + $0x318] sm:$0xff]  ;;  %v160_v6 = vld [vmem:[#allocation2 + $0x2a8] sm:$0xff]  ;;  %v1824_v9 = vpack.c.bf16 %v142_v1, %v141_v63 }
  0x42   :  { %v191_v7 = vld [vmem:[#allocation2 + $0x3a0] sm:$0xff]  ;;  %v192_v8 = vld [vmem:[#allocation2 + $0x3a8] sm:$0xff]  ;;  %v1856_v10 = vpack.c.bf16 %v174_v4, %v173_v2  ;;  %v1826_v11 = vpack.c.bf16 %v160_v6, %v159_v5  ;;  %v161_v18 = vld [vmem:[#allocation2 + $0x2b0] sm:$0xff] }
  0x43   :  { %1781 = vmatpush3.bf16.msra.mxu0 %v1780_v33  ;;  %v143_v12 = vld [vmem:[#allocation2 + $0x220] sm:$0xff]  ;;  %v144_v14 = vld [vmem:[#allocation2 + $0x228] sm:$0xff]  ;;  %v1858_v16 = vpack.c.bf16 %v192_v8, %v191_v7  ;;  %v162_v19 = vld [vmem:[#allocation2 + $0x2b8] sm:$0xff] }
  0x44   :  { %1813 = vmatpush3.bf16.msra.mxu1 %v1812_v36  ;;  %1783 = vmatprep.subr.bf16.mxu0 %v1782_v37  ;;  %v175_v15 = vld [vmem:[#allocation2 + $0x320] sm:$0xff]  ;;  %v176_v17 = vld [vmem:[#allocation2 + $0x328] sm:$0xff]  ;;  %v193_v20 = vld [vmem:[#allocation2 + $0x3b0] sm:$0xff]  ;;  %v1828_v22 = vpack.c.bf16 %v144_v14, %v143_v12  ;;  %v1830_v24 = vpack.c.bf16 %v162_v19, %v161_v18 }
  0x45   :  { %1815 = vmatprep.subr.bf16.mxu1 %v1814_v41  ;;  %v194_v21 = vld [vmem:[#allocation2 + $0x3b8] sm:$0xff]  ;;  %v1860_v23 = vpack.c.bf16 %v176_v17, %v175_v15  ;;  %v145_v25 = vld [vmem:[#allocation2 + $0x230] sm:$0xff]  ;;  %v163_v31 = vld [vmem:[#allocation2 + $0x2c0] sm:$0xff] }
  0x46   :  { %v146_v26 = vld [vmem:[#allocation2 + $0x238] sm:$0xff]  ;;  %v1862_v28 = vpack.c.bf16 %v194_v21, %v193_v20  ;;  %v164_v33 = vld [vmem:[#allocation2 + $0x2c8] sm:$0xff]  ;;  %v195_v34 = vld [vmem:[#allocation2 + $0x3c0] sm:$0xff] }
  0x47   :  { %1785 = vmatpush3.bf16.msra.mxu0 %v1784_v48  ;;  %v178_v30 = vld [vmem:[#allocation2 + $0x338] sm:$0xff]  ;;  %v73_v36 = vld [vmem:[%s2518_s0 + $0x8] sm:$0xff]  ;;  %v1832_v37 = vpack.c.bf16 %v146_v26, %v145_v25  ;;  %v1834_v41 = vpack.c.bf16 %v164_v33, %v163_v31  ;;  %v147_v42 = vld [vmem:[#allocation2 + $0x240] sm:$0xff] }
  0x48   :  { %1817 = vmatpush3.bf16.msra.mxu1 %v1816_v49  ;;  %1819 = vmatprep.subr.bf16.mxu0 %v1818_v50  ;;  %v2263_v38 = vrot.slane %v73_v36, %v2250_v13  ;;  %v231_v39 = vcombine.high %v73_v36, %v73_v36  ;;  %v148_v43 = vld [vmem:[#allocation2 + $0x248] sm:$0xff]  ;;  %v179_v44 = vld [vmem:[#allocation2 + $0x340] sm:$0xff]  ;;  %v165_v47 = vld [vmem:[#allocation2 + $0x2d0] sm:$0xff] }
  0x49   :  { %1851 = vmatprep.subr.bf16.mxu1 %v1850_v54  ;;  %v180_v46 = vld [vmem:[#allocation2 + $0x348] sm:$0xff]  ;;  %v166_v48 = vld [vmem:[#allocation2 + $0x2d8] sm:$0xff]  ;;  %v197_v51 = vld [vmem:[#allocation2 + $0x3d0] sm:$0xff]  ;;  %v1836_v53 = vpack.c.bf16 %v148_v43, %v147_v42 }
  0x4a   :  { %331 = vmatmul.mubr.f32.vlgmr.msra.gmra.mrb[0].mxu0 %v221_v27  ;;  %v177_v27 = vld [vmem:[#allocation2 + $0x330] sm:$0xff]  ;;  %v246_v49 = vcombine.high %v2263_v38, %v2263_v38  ;;  %v2268_v50 = vrot.slane %v231_v39, %v2250_v13  ;;  %v198_v52 = vld [vmem:[#allocation2 + $0x3d8] sm:$0xff]  ;;  %v1868_v55 = vpack.c.bf16 %v180_v46, %v179_v44  ;;  %v1838_v56 = vpack.c.bf16 %v166_v48, %v165_v47  ;;  %v168_v63 = vld [vmem:[#allocation2 + $0x2e8] sm:$0xff] }
  0x4b   :  { %401 = vmatmul.mubr.f32.vlgmr.msra.gmra.mrb[0].mxu1 %v228_v35  ;;  %1821 = vmatpush3.bf16.msra.mxu0 %v1820_v60  ;;  %v196_v35 = vld [vmem:[#allocation2 + $0x3c8] sm:$0xff]  ;;  %v1864_v40 = vpack.c.bf16 %v178_v30, %v177_v27  ;;  %v149_v57 = vld [vmem:[#allocation2 + $0x250] sm:$0xff]  ;;  %v150_v58 = vld [vmem:[#allocation2 + $0x258] sm:$0xff]  ;;  %v1870_v60 = vpack.c.bf16 %v198_v52, %v197_v51 }
  0x4c   :  { %1853 = vmatpush3.bf16.msra.mxu1 %v1852_v61  ;;  %1823 = vmatprep.subr.bf16.mxu0 %v1822_v62  ;;  %v1866_v45 = vpack.c.bf16 %v196_v35, %v195_v34  ;;  %v247_v54 = vcombine.high %v2268_v50, %v2268_v50  ;;  %v181_v59 = vld [vmem:[#allocation2 + $0x350] sm:$0xff]  ;;  %v182_v61 = vld [vmem:[#allocation2 + $0x358] sm:$0xff]  ;;  %v167_v62 = vld [vmem:[#allocation2 + $0x2e0] sm:$0xff] }
  0x4d   :  { %1855 = vmatprep.subr.bf16.mxu1 %v1854_v3  ;;  %470 = vmatprep.mubr.f32.mxu0 %v246_v49  ;;  %v199_v1 = vld [vmem:[#allocation2 + $0x3e0] sm:$0xff]  ;;  %v200_v2 = vld [vmem:[#allocation2 + $0x3e8] sm:$0xff]  ;;  %v1840_v3 = vpack.c.bf16 %v150_v58, %v149_v57  ;;  %v1872_v4 = vpack.c.bf16 %v182_v61, %v181_v59  ;;  %v1842_v5 = vpack.c.bf16 %v168_v63, %v167_v62  ;;  %v170_v12 = vld [vmem:[#allocation2 + $0x2f8] sm:$0xff] }
  0x4e   :  { %540 = vmatprep.mubr.f32.mxu1 %v247_v54  ;;  %v151_v6 = vld [vmem:[#allocation2 + $0x260] sm:$0xff]  ;;  %v152_v7 = vld [vmem:[#allocation2 + $0x268] sm:$0xff]  ;;  %v201_v14 = vld [vmem:[#allocation2 + $0x3f0] sm:$0xff] }
  0x4f   :  { %1825 = vmatpush3.bf16.msra.mxu0 %v1824_v9  ;;  %v183_v8 = vld [vmem:[#allocation2 + $0x360] sm:$0xff]  ;;  %v1874_v9 = vpack.c.bf16 %v200_v2, %v199_v1  ;;  %v202_v15 = vld [vmem:[#allocation2 + $0x3f8] sm:$0xff]  ;;  %v153_v19 = vld [vmem:[#allocation2 + $0x270] sm:$0xff] }
  0x50   :  { %1857 = vmatpush3.bf16.msra.mxu1 %v1856_v10  ;;  %1827 = vmatprep.subr.bf16.mxu0 %v1826_v11  ;;  %v184_v10 = vld [vmem:[#allocation2 + $0x368] sm:$0xff]  ;;  %v169_v11 = vld [vmem:[#allocation2 + $0x2f0] sm:$0xff]  ;;  %v154_v20 = vld [vmem:[#allocation2 + $0x278] sm:$0xff]  ;;  %v1878_v21 = vpack.c.bf16 %v202_v15, %v201_v14 }
  0x51   :  { %1859 = vmatprep.subr.bf16.mxu1 %v1858_v16  ;;  %v1844_v16 = vpack.c.bf16 %v152_v7, %v151_v6  ;;  %v1876_v17 = vpack.c.bf16 %v184_v10, %v183_v8  ;;  %v1846_v18 = vpack.c.bf16 %v170_v12, %v169_v11  ;;  %v637_v25 = vld [vmem:[#allocation5 + $0x88] sm:$0xff]  ;;  %v1848_v26 = vpack.c.bf16 %v154_v20, %v153_v19  ;;  %v620_v33 = vld [vmem:[#allocation5] sm:$0xff]  ;;  %v638_v36 = vld [vmem:[#allocation5 + $0x90] sm:$0xff] }
  0x52   :  { %v204_v30 = vld [vmem:[#allocation2 + $0x408] sm:$0xff]  ;;  %v617_v35 = vld [vmem:[%s2520_s2] sm:$0xff]  ;;  %v205_v43 = vld [vmem:[#allocation2 + $0x410] sm:$0xff] }
  0x53   :  { %1829 = vmatpush3.bf16.msra.mxu0 %v1828_v22  ;;  %v185_v22 = vld [vmem:[#allocation2 + $0x370] sm:$0xff]  ;;  %v621_v34 = vld [vmem:[#allocation5 + $0x8] sm:$0xff]  ;;  %v2276_v39 = vrot.slane %v617_v35, %v2250_v13  ;;  %v206_v44 = vld [vmem:[#allocation2 + $0x418] sm:$0xff]  ;;  %v759_v61 = vcombine.high %v617_v35, %v617_v35 }
  0x54   :  { %1861 = vmatpush3.bf16.msra.mxu1 %v1860_v23  ;;  %1831 = vmatprep.subr.bf16.mxu0 %v1830_v24  ;;  %v186_v23 = vld [vmem:[#allocation2 + $0x378] sm:$0xff]  ;;  %v636_v24 = vld [vmem:[#allocation5 + $0x80] sm:$0xff]  ;;  %v1896_v42 = vpack.c.bf16 %v621_v34, %v620_v33  ;;  %v622_v46 = vld [vmem:[#allocation5 + $0x10] sm:$0xff]  ;;  %v1886_v52 = vpack.c.bf16 %v206_v44, %v205_v43 }
  0x55   :  { %1863 = vmatprep.subr.bf16.mxu1 %v1862_v28  ;;  %v1880_v27 = vpack.c.bf16 %v186_v23, %v185_v22  ;;  %v203_v28 = vld [vmem:[#allocation2 + $0x400] sm:$0xff]  ;;  %v1894_v31 = vpack.c.bf16 %v637_v25, %v636_v24  ;;  %v623_v47 = vld [vmem:[#allocation5 + $0x18] sm:$0xff]  ;;  %v641_v49 = vld [vmem:[#allocation5 + $0xa8] sm:$0xff]  ;;  %v774_v51 = vcombine.high %v2276_v39, %v2276_v39  ;;  %v2288_v10 = vrot.slane %v759_v61, %v2250_v13 }
  0x56   :  { %v640_v48 = vld [vmem:[#allocation5 + $0xa0] sm:$0xff]  ;;  %v625_v58 = vld [vmem:[#allocation5 + $0x28] sm:$0xff]  ;;  %v642_v59 = vld [vmem:[#allocation5 + $0xb0] sm:$0xff] }
  0x57   :  { %1833 = vmatpush3.bf16.msra.mxu0 %v1832_v37  ;;  %v639_v37 = vld [vmem:[#allocation5 + $0x98] sm:$0xff]  ;;  %v207_v54 = vld [vmem:[#allocation2 + $0x420] sm:$0xff]  ;;  %v209_v63 = vld [vmem:[#allocation2 + $0x430] sm:$0xff]  ;;  %v775_v25 = vcombine.high %v2288_v10, %v2288_v10 }
  0x58   :  { %1865 = vmatpush3.bf16.msra.mxu1 %v1864_v40  ;;  %1835 = vmatprep.subr.bf16.mxu0 %v1834_v41  ;;  %v1883_v40 = vpack.c.bf16 %v204_v30, %v203_v28  ;;  %v2137_v41 = vmov 0.0|0.0   ;;  %v624_v57 = vld [vmem:[#allocation5 + $0x20] sm:$0xff]  ;;  %v210_v1 = vld [vmem:[#allocation2 + $0x438] sm:$0xff]  ;;  %v626_v2 = vld [vmem:[#allocation5 + $0x30] sm:$0xff] }
  0x59   :  { %1867 = vmatprep.subr.bf16.mxu1 %v1866_v45  ;;  %v1898_v45 = vpack.c.bf16 %v639_v37, %v638_v36  ;;  %v1904_v62 = vpack.c.bf16 %v625_v58, %v624_v57  ;;  %v669_v6 = vld [vmem:[#allocation5 + $0x188] sm:$0xff]  ;;  %v644_v7 = vld [vmem:[#allocation5 + $0xc0] sm:$0xff]  ;;  %v670_v19 = vld [vmem:[#allocation5 + $0x190] sm:$0xff] }
  0x5a   :  { %v645_v8 = vld [vmem:[#allocation5 + $0xc8] sm:$0xff]  ;;  %v628_v14 = vld [vmem:[#allocation5 + $0x40] sm:$0xff]  ;;  %v671_v20 = vld [vmem:[#allocation5 + $0x198] sm:$0xff] }
  0x5b   :  { %1837 = vmatpush3.bf16.msra.mxu0 %v1836_v53  ;;  %v1900_v53 = vpack.c.bf16 %v623_v47, %v622_v46  ;;  %v652_v15 = vld [vmem:[#allocation5 + $0x100] sm:$0xff]  ;;  %v647_v22 = vld [vmem:[#allocation5 + $0xd8] sm:$0xff]  ;;  %v1412_v23 = vld.sshfl [vmem:[%s2518_s0 + $0x10] sm:$0x3 pattern:$0x76325410] }
  0x5c   :  { %1869 = vmatpush3.bf16.msra.mxu1 %v1868_v55  ;;  %1839 = vmatprep.subr.bf16.mxu0 %v1838_v56  ;;  %v208_v55 = vld [vmem:[#allocation2 + $0x428] sm:$0xff]  ;;  %v1902_v56 = vpack.c.bf16 %v641_v49, %v640_v48  ;;  %v630_v28 = vld [vmem:[#allocation5 + $0x50] sm:$0xff]  ;;  %v631_v34 = vld [vmem:[#allocation5 + $0x58] sm:$0xff] }
  0x5d   :  { %1871 = vmatprep.subr.bf16.mxu1 %v1870_v60  ;;  %v643_v60 = vld [vmem:[#allocation5 + $0xb8] sm:$0xff]  ;;  %v654_v30 = vld [vmem:[#allocation5 + $0x110] sm:$0xff]  ;;  %v672_v35 = vld [vmem:[#allocation5 + $0x1a0] sm:$0xff]  ;;  %v1916_v43 = vpack.c.bf16 %v631_v34, %v630_v28 }
  0x5e   :  { %v673_v36 = vld [vmem:[#allocation5 + $0x1a8] sm:$0xff]  ;;  %v648_v37 = vld [vmem:[#allocation5 + $0xe0] sm:$0xff]  ;;  %v634_v58 = vld [vmem:[#allocation5 + $0x70] sm:$0xff] }
  0x5f   :  { %1841 = vmatpush3.bf16.msra.mxu0 %v1840_v3  ;;  %v1906_v3 = vpack.c.bf16 %v643_v60, %v642_v59  ;;  %v1934_v44 = vpack.c.bf16 %v673_v36, %v672_v35  ;;  %v656_v46 = vld [vmem:[#allocation5 + $0x120] sm:$0xff]  ;;  %v657_v47 = vld [vmem:[#allocation5 + $0x128] sm:$0xff]  ;;  %v658_v59 = vld [vmem:[#allocation5 + $0x130] sm:$0xff] }
  0x60   :  { %1873 = vmatpush3.bf16.msra.mxu1 %v1872_v4  ;;  %1843 = vmatprep.subr.bf16.mxu0 %v1842_v5  ;;  %v627_v4 = vld [vmem:[#allocation5 + $0x38] sm:$0xff]  ;;  %v668_v5 = vld [vmem:[#allocation5 + $0x180] sm:$0xff]  ;;  %v633_v49 = vld [vmem:[#allocation5 + $0x68] sm:$0xff] }
  0x61   :  { %1875 = vmatprep.subr.bf16.mxu1 %v1874_v9  ;;  %v1892_v9 = vpack.c.bf16 %v210_v1, %v209_v63  ;;  %v1908_v11 = vpack.c.bf16 %v627_v4, %v626_v2  ;;  %v1926_v12 = vpack.c.bf16 %v669_v6, %v668_v5  ;;  %v659_v60 = vld [vmem:[#allocation5 + $0x138] sm:$0xff]  ;;  %v677_v63 = vld [vmem:[#allocation5 + $0x1c8] sm:$0xff]  ;;  %v700_v1 = vld [vmem:[#allocation5 + $0x280] sm:$0xff] }
  0x62   :  { %v635_v61 = vld [vmem:[#allocation5 + $0x78] sm:$0xff]  ;;  %v701_v2 = vld [vmem:[#allocation5 + $0x288] sm:$0xff]  ;;  %v1940_v4 = vpack.c.bf16 %v659_v60, %v658_v59  ;;  %v2305_v5 = vld [vmem:[%s2523_s5] sm:$0xff] }
  0x63   :  { %1845 = vmatpush3.bf16.msra.mxu0 %v1844_v16  ;;  %v653_v16 = vld [vmem:[#allocation5 + $0x108] sm:$0xff]  ;;  %v1924_v6 = vpack.c.bf16 %v635_v61, %v634_v58  ;;  %1197 = vperm.xlu1 %2048, %v2305_v5   ;;  %v687_v28 = vld [vmem:[#allocation5 + $0x218] sm:$0xff]  ;;  %v704_v34 = vld [vmem:[#allocation5 + $0x2a0] sm:$0xff] }
  0x64   :  { %1877 = vmatpush3.bf16.msra.mxu1 %v1876_v17  ;;  %1847 = vmatprep.subr.bf16.mxu0 %v1846_v18  ;;  %v1910_v17 = vpack.c.bf16 %v645_v8, %v644_v7  ;;  %v629_v18 = vld [vmem:[#allocation5 + $0x48] sm:$0xff]  ;;  %v1928_v24 = vpack.c.bf16 %v653_v16, %v652_v15  ;;  %v660_v8 = vld [vmem:[#allocation5 + $0x140] sm:$0xff]  ;;  %v678_v15 = vld [vmem:[#allocation5 + $0x1d0] sm:$0xff] }
  0x65   :  { %1879 = vmatprep.subr.bf16.mxu1 %v1878_v21  ;;  %v646_v21 = vld [vmem:[#allocation5 + $0xd0] sm:$0xff]  ;;  %v679_v16 = vld [vmem:[#allocation5 + $0x1d8] sm:$0xff]  ;;  %1176 = vperm.xlu0 %2047, %v2305_v5   ;;  %v705_v35 = vld [vmem:[#allocation5 + $0x2a8] sm:$0xff] }
  0x66   :  { %v1914_v33 = vpack.c.bf16 %v647_v22, %v646_v21  ;;  %v667_v58 = vld [vmem:[#allocation5 + $0x178] sm:$0xff]  ;;  %v690_v59 = vld [vmem:[#allocation5 + $0x230] sm:$0xff]  ;;  %v733_v61 = vld [vmem:[#allocation5 + $0x388] sm:$0xff] }
  0x67   :  { %1849 = vmatpush3.bf16.msra.mxu0 %v1848_v26  ;;  %v1912_v26 = vpack.c.bf16 %v629_v18, %v628_v14  ;;  %v685_v14 = vld [vmem:[#allocation5 + $0x208] sm:$0xff]  ;;  %v702_v18 = vld [vmem:[#allocation5 + $0x290] sm:$0xff] }
  0x68   :  { %1881 = vmatpush3.bf16.msra.mxu1 %v1880_v27  ;;  %1882 = vmatprep.subr.bf16.mxu0 %v2137_v41  ;;  %v1930_v27 = vpack.c.bf16 %v671_v20, %v670_v19  ;;  %v703_v19 = vld [vmem:[#allocation5 + $0x298] sm:$0xff]  ;;  %v2316_v20 = vld [vmem:[%s2523_s5 + $0x8] sm:$0x3] }
  0x69   :  { %1895 = vmatprep.subr.bf16.mxu1 %v1894_v31  ;;  %v655_v31 = vld [vmem:[#allocation5 + $0x118] sm:$0xff]  ;;  %1201 = vperm.xlu1 %2048, %v2316_v20  }
  0x6a   :  { %471 = vmatmul.mubr.f32.vlgmr.msra.gmra.mrb[2].mxu0 %v2263_v38  ;;  %v2139_v38 = vmov 0.0   ;;  %1181 = vperm.xlu0 %2047, %v2316_v20  }
  0x6b   :  { %541 = vmatmul.mubr.f32.vlgmr.msra.gmra.mrb[2].mxu1 %v2268_v50  ;;  %1884 = vmatpush3.bf16.msra.mxu0 %v1883_v40  ;;  %v1889_v50 = vpack.c.bf16 %v208_v55, %v207_v54  ;;  %v649_v40 = vld [vmem:[#allocation5 + $0xe8] sm:$0xff]  ;;  %v651_v54 = vld [vmem:[#allocation5 + $0xf8] sm:$0xff]  ;;  %v1936_v55 = vpack.c.bf16 %v657_v47, %v656_v46 }
  0x6c   :  { %1897 = vmatpush3.bf16.msra.mxu1 %v1896_v42  ;;  %1885 = vmatprep.subr.bf16.mxu0 %v2137_v41  ;;  %v1932_v42 = vpack.c.bf16 %v655_v31, %v654_v30  ;;  %v1918_v48 = vpack.c.bf16 %v649_v40, %v648_v37  ;;  %v680_v30 = vld [vmem:[#allocation5 + $0x1e0] sm:$0xff]  ;;  %v681_v31 = vld [vmem:[#allocation5 + $0x1e8] sm:$0xff] }
  0x6d   :  { %1899 = vmatprep.subr.bf16.mxu1 %v1898_v45  ;;  %1732 = vmatprep.mubr.msk.f32.mxu0 %vm2138_vm0, %v2139_v38  ;;  %v632_v45 = vld [vmem:[#allocation5 + $0x60] sm:$0xff]  ;;  %v2331_v46 = vld [vmem:[%s2524_s6 + $0x8] sm:$0x3] }
  0x6e   :  { %874 = vmatprep.mubr.f32.mxu1 %v774_v51  ;;  %v674_v51 = vld [vmem:[#allocation5 + $0x1b0] sm:$0xff]  ;;  %v664_v37 = vld [vmem:[#allocation5 + $0x160] sm:$0xff]  ;;  %v689_v47 = vld [vmem:[#allocation5 + $0x228] sm:$0xff]  ;;  %2049 = vset.pattern.permute.xlu1 %v2136_v32 }
  0x6f   :  { %1887 = vmatpush3.bf16.msra.mxu0 %v1886_v52  ;;  %v675_v52 = vld [vmem:[#allocation5 + $0x1b8] sm:$0xff]  ;;  %v2326_v40 = vld [vmem:[%s2524_s6] sm:$0xff]  ;;  %1269 = vperm.xlu1 %2049, %v2331_v46  }
  0x70   :  { %1901 = vmatpush3.bf16.msra.mxu1 %v1900_v53  ;;  %1888 = vmatprep.subr.bf16.mxu0 %v2137_v41  ;;  %v650_v53 = vld [vmem:[#allocation5 + $0xf0] sm:$0xff]  ;;  %v1938_v57 = vpack.c.bf16 %v675_v52, %v674_v51  ;;  %v707_v52 = vld [vmem:[#allocation5 + $0x2b8] sm:$0xff]  ;;  %v732_v32 = vld [vmem:[#allocation5 + $0x380] sm:$0xff] }
  0x71   :  { %1903 = vmatprep.subr.bf16.mxu1 %v1902_v56  ;;  %v1920_v56 = vpack.c.bf16 %v633_v49, %v632_v45  ;;  %v688_v45 = vld [vmem:[#allocation5 + $0x220] sm:$0xff]  ;;  %v683_v49 = vld [vmem:[#allocation5 + $0x1f8] sm:$0xff]  ;;  %v706_v51 = vld [vmem:[#allocation5 + $0x2b0] sm:$0xff]  ;;  %1264 = vperm.xlu0 %2047, %v2326_v40  }
  0x72   :  { %v1970_v60 = vpack.c.bf16 %v707_v52, %v706_v51  ;;  %v698_v52 = vld [vmem:[#allocation5 + $0x270] sm:$0xff] }
  0x73   :  { %1890 = vmatpush3.bf16.msra.mxu0 %v1889_v50  ;;  %v1922_v50 = vpack.c.bf16 %v651_v54, %v650_v53  ;;  %2051 = vset.pattern.permute.xlu1 %v2135_v29 }
  0x74   :  { %1905 = vmatpush3.bf16.msra.mxu1 %v1904_v62  ;;  %1891 = vmatprep.subr.bf16.mxu0 %v2137_v41  ;;  %v676_v62 = vld [vmem:[#allocation5 + $0x1c0] sm:$0xff] }
  0x75   :  { %1907 = vmatprep.subr.bf16.mxu1 %v1906_v3  ;;  %v2300_v3 = vld [vmem:[%s2520_s2 + $0x8] sm:$0xff]  ;;  %v1942_v7 = vpack.c.bf16 %v677_v63, %v676_v62  ;;  %v708_v62 = vld [vmem:[#allocation5 + $0x2c0] sm:$0xff]  ;;  %2050 = vset.pattern.permute.xlu0 %v2135_v29 }
  0x76   :  { %v776_v54 = vcombine.high %v2300_v3, %v2300_v3  ;;  %v709_v63 = vld [vmem:[#allocation5 + $0x2c8] sm:$0xff]  ;;  %1281 = vperm.xlu1 %2051, %v2331_v46   ;;  %1277 = vperm.xlu0 %2050, %v2326_v40  }
  0x77   :  { %1893 = vmatpush3.bf16.msra.mxu0 %v1892_v9  ;;  %v661_v9 = vld [vmem:[#allocation5 + $0x148] sm:$0xff] }
  0x78   :  { %1909 = vmatpush3.bf16.msra.mxu1 %v1908_v11  ;;  %1927 = vmatprep.subr.bf16.mxu0 %v1926_v12  ;;  %v684_v11 = vld [vmem:[#allocation5 + $0x200] sm:$0xff]  ;;  %v1958_v12 = vpack.c.bf16 %v701_v2, %v700_v1  ;;  %v1944_v21 = vpack.c.bf16 %v661_v9, %v660_v8  ;;  %v2340_v2 = vrot.slane %v776_v54, %v2250_v13  ;;  %v717_v8 = vld [vmem:[#allocation5 + $0x308] sm:$0xff]  ;;  %v723_v54 = vld [vmem:[#allocation5 + $0x338] sm:$0xff] }
  0x79   :  { %1911 = vmatprep.subr.bf16.mxu1 %v1910_v17  ;;  %v2309_v17 = vrot.slane %v2300_v3, %v2250_v13  ;;  %v1960_v22 = vpack.c.bf16 %v685_v14, %v684_v11  ;;  %v1974_v9 = vpack.c.bf16 %v709_v63, %v708_v62  ;;  %v693_v11 = vld [vmem:[#allocation5 + $0x248] sm:$0xff]  ;;  %v735_v14 = vld [vmem:[#allocation5 + $0x398] sm:$0xff]  ;;  %v748_v62 = vld [vmem:[#allocation5 + $0x400] sm:$0xff] }
  0x7a   :  { %1733 = vmatmul.mubr.msk.f32.vlgmr.msra.gmra.mrb[4].mxu0 %vm263_vm1, %v1412_v23  ;;  %v1946_v23 = vpack.c.bf16 %v679_v16, %v678_v15  ;;  %v710_v15 = vld [vmem:[#allocation5 + $0x2d0] sm:$0xff]  ;;  %v711_v16 = vld [vmem:[#allocation5 + $0x2d8] sm:$0xff]  ;;  %v792_v29 = vcombine.high %v2340_v2, %v2340_v2  ;;  %v749_v63 = vld [vmem:[#allocation5 + $0x408] sm:$0xff] }
  0x7b   :  { %1929 = vmatpush3.bf16.msra.mxu0 %v1928_v24  ;;  %944 = vmatprep.mubr.f32.mxu0 %v775_v25  ;;  %v662_v24 = vld [vmem:[#allocation5 + $0x150] sm:$0xff]  ;;  %v663_v25 = vld [vmem:[#allocation5 + $0x158] sm:$0xff] }
  0x7c   :  { %1913 = vmatpush3.bf16.msra.mxu1 %v1912_v26  ;;  %1931 = vmatprep.subr.bf16.mxu0 %v1930_v27  ;;  %v686_v26 = vld [vmem:[#allocation5 + $0x210] sm:$0xff]  ;;  %v1962_v27 = vpack.c.bf16 %v703_v19, %v702_v18  ;;  %v1948_v36 = vpack.c.bf16 %v663_v25, %v662_v24  ;;  %v1978_v24 = vpack.c.bf16 %v711_v16, %v710_v15  ;;  %v695_v25 = vld [vmem:[#allocation5 + $0x258] sm:$0xff]  ;;  %v729_v15 = vld [vmem:[#allocation5 + $0x368] sm:$0xff] }
  0x7d   :  { %1915 = vmatprep.subr.bf16.mxu1 %v1914_v33  ;;  %v791_v33 = vcombine.high %v2309_v17, %v2309_v17 }
  0x7f   :  { %1933 = vmatpush3.bf16.msra.mxu0 %v1932_v42  ;;  %v1964_v42 = vpack.c.bf16 %v687_v28, %v686_v26  ;;  %v736_v26 = vld [vmem:[#allocation5 + $0x3a0] sm:$0xff]  ;;  %v2140_v28 = vmov 2  }
  0x80   :  { %1917 = vmatpush3.bf16.msra.mxu1 %v1916_v43  ;;  %1935 = vmatprep.subr.bf16.mxu0 %v1934_v44  ;;  %v1950_v43 = vpack.c.bf16 %v681_v31, %v680_v30  ;;  %v665_v44 = vld [vmem:[#allocation5 + $0x168] sm:$0xff]  ;;  %v712_v30 = vld [vmem:[#allocation5 + $0x2e0] sm:$0xff] }
  0x81   :  { %1919 = vmatprep.subr.bf16.mxu1 %v1918_v48  ;;  %v682_v48 = vld [vmem:[#allocation5 + $0x1f0] sm:$0xff]  ;;  %v1952_v53 = vpack.c.bf16 %v665_v44, %v664_v37  ;;  %2052 = vset.pattern.permute.xlu1 %v2140_v28  ;;  %v713_v31 = vld [vmem:[#allocation5 + $0x2e8] sm:$0xff]  ;;  %v720_v37 = vld [vmem:[#allocation5 + $0x320] sm:$0xff] }
  0x82   :  { %2053 = vset.pattern.permute.xlu0 %v2140_v28  ;;  %v697_v44 = vld [vmem:[#allocation5 + $0x268] sm:$0xff]  ;;  %1221 = vperm.xlu1 %2052, %v2305_v5  }
  0x83   :  { %1937 = vmatpush3.bf16.msra.mxu0 %v1936_v55  ;;  %v1968_v55 = vpack.c.bf16 %v689_v47, %v688_v45  ;;  %v738_v45 = vld [vmem:[#allocation5 + $0x3b0] sm:$0xff]  ;;  %v715_v47 = vld [vmem:[#allocation5 + $0x2f8] sm:$0xff]  ;;  %1225 = vperm.xlu0 %2053, %v2316_v20  }
  0x84   :  { %1921 = vmatpush3.bf16.msra.mxu1 %v1920_v56  ;;  %1939 = vmatprep.subr.bf16.mxu0 %v1938_v57  ;;  %v1954_v56 = vpack.c.bf16 %v683_v49, %v682_v48  ;;  %v666_v57 = vld [vmem:[#allocation5 + $0x170] sm:$0xff] }
  0x85   :  { %1923 = vmatprep.subr.bf16.mxu1 %v1922_v50  ;;  %v691_v50 = vld [vmem:[#allocation5 + $0x238] sm:$0xff]  ;;  %v1956_v1 = vpack.c.bf16 %v667_v58, %v666_v57  ;;  %v740_v57 = vld [vmem:[#allocation5 + $0x3c0] sm:$0xff]  ;;  %v741_v58 = vld [vmem:[#allocation5 + $0x3c8] sm:$0xff] }
  0x86   :  { %v1972_v3 = vpack.c.bf16 %v691_v50, %v690_v59  ;;  %1293 = vperm.xlu1 %2052, %v2326_v40   ;;  %v2006_v59 = vpack.c.bf16 %v741_v58, %v740_v57  ;;  %v725_v50 = vld [vmem:[#allocation5 + $0x348] sm:$0xff] }
  0x87   :  { %1941 = vmatpush3.bf16.msra.mxu0 %v1940_v4  ;;  %v1990_v4 = vpack.c.bf16 %v733_v61, %v732_v32  ;;  %v742_v32 = vld [vmem:[#allocation5 + $0x3d0] sm:$0xff]  ;;  %v743_v61 = vld [vmem:[#allocation5 + $0x3d8] sm:$0xff] }
  0x88   :  { %1925 = vmatpush3.bf16.msra.mxu1 %v1924_v6  ;;  %1943 = vmatprep.subr.bf16.mxu0 %v1942_v7  ;;  %v692_v6 = vld [vmem:[#allocation5 + $0x240] sm:$0xff]  ;;  %v2010_v40 = vpack.c.bf16 %v743_v61, %v742_v32 }
  0x89   :  { %1959 = vmatprep.subr.bf16.mxu1 %v1958_v12  ;;  %v716_v7 = vld [vmem:[#allocation5 + $0x300] sm:$0xff]  ;;  %v734_v12 = vld [vmem:[#allocation5 + $0x390] sm:$0xff]  ;;  %v1976_v18 = vpack.c.bf16 %v693_v11, %v692_v6  ;;  %v2023_v6 = vpack.c.bf16 %v749_v63, %v748_v62  ;;  %v751_v11 = vld [vmem:[#allocation5 + $0x418] sm:$0xff] }
  0x8a   :  { %v1992_v13 = vpack.c.bf16 %v717_v8, %v716_v7  ;;  %v1994_v19 = vpack.c.bf16 %v735_v14, %v734_v12  ;;  %1297 = vperm.xlu1 %2052, %v2331_v46   ;;  %v744_v7 = vld [vmem:[#allocation5 + $0x3e0] sm:$0xff]  ;;  %v745_v8 = vld [vmem:[#allocation5 + $0x3e8] sm:$0xff] }
  0x8b   :  { %875 = vmatmul.mubr.f32.vlgmr.msra.gmra.mrb[4].mxu1 %v2276_v39  ;;  %1945 = vmatpush3.bf16.msra.mxu0 %v1944_v21  ;;  %v1966_v39 = vpack.c.bf16 %v705_v35, %v704_v34  ;;  %v694_v21 = vld [vmem:[#allocation5 + $0x250] sm:$0xff]  ;;  %v2014_v46 = vpack.c.bf16 %v745_v8, %v744_v7  ;;  %v728_v14 = vld [vmem:[#allocation5 + $0x360] sm:$0xff] }
  0x8c   :  { %1961 = vmatpush3.bf16.msra.mxu1 %v1960_v22  ;;  %1947 = vmatprep.subr.bf16.mxu0 %v1946_v23  ;;  %v718_v22 = vld [vmem:[#allocation5 + $0x310] sm:$0xff]  ;;  %v719_v23 = vld [vmem:[#allocation5 + $0x318] sm:$0xff]  ;;  %v1980_v34 = vpack.c.bf16 %v695_v25, %v694_v21  ;;  %v2016_v21 = vpack.c.bf16 %v729_v15, %v728_v14 }
  0x8d   :  { %1963 = vmatprep.subr.bf16.mxu1 %v1962_v27  ;;  %1014 = vmatprep.mubr.f32.mxu1 %v791_v33  ;;  %v737_v27 = vld [vmem:[#allocation5 + $0x3a8] sm:$0xff]  ;;  %v1996_v33 = vpack.c.bf16 %v719_v23, %v718_v22  ;;  %v730_v22 = vld [vmem:[#allocation5 + $0x370] sm:$0xff]  ;;  %v731_v23 = vld [vmem:[#allocation5 + $0x378] sm:$0xff] }
  0x8e   :  { %v1998_v35 = vpack.c.bf16 %v737_v27, %v736_v26  ;;  %v754_v25 = vld [vmem:[#allocation5 + $0x430] sm:$0xff]  ;;  %v755_v26 = vld [vmem:[#allocation5 + $0x438] sm:$0xff]  ;;  %v2020_v27 = vpack.c.bf16 %v731_v23, %v730_v22 }
  0x8f   :  { %1949 = vmatpush3.bf16.msra.mxu0 %v1948_v36  ;;  %v696_v36 = vld [vmem:[#allocation5 + $0x260] sm:$0xff]  ;;  %v2032_v28 = vpack.c.bf16 %v755_v26, %v754_v25 }
  0x90   :  { %1965 = vmatpush3.bf16.msra.mxu1 %v1964_v42  ;;  %1951 = vmatprep.subr.bf16.mxu0 %v1950_v43  ;;  %v721_v42 = vld [vmem:[#allocation5 + $0x328] sm:$0xff]  ;;  %v1982_v43 = vpack.c.bf16 %v713_v31, %v712_v30  ;;  %v1984_v49 = vpack.c.bf16 %v697_v44, %v696_v36  ;;  %v1164_v30 = vld [vmem:[%s2527_s9] sm:$0xff]  ;;  %v1206_v36 = vsub.s32 1, %v2247_v0 }
  0x91   :  { %1967 = vmatprep.subr.bf16.mxu1 %v1966_v39  ;;  %v739_v39 = vld [vmem:[#allocation5 + $0x3b8] sm:$0xff]  ;;  %v2000_v48 = vpack.c.bf16 %v721_v42, %v720_v37  ;;  %v1165_v31 = vld [vmem:[%s2527_s9 + $0x8] sm:$0xff]  ;;  %1322 = vst.msk [vmem:[%s2532_s14] sm:$0xff] %vm1254_vm2, %v1164_v30  ;;  %1327 = vst.msk [vmem:[%s2532_s14 + $0x20] sm:$0xff] %vm1254_vm2, %v1164_v30  ;;  %v2402_v42 = vsub.s32 0, %v2247_v0 }
  0x92   :  { %v2002_v51 = vpack.c.bf16 %v739_v39, %v738_v45  ;;  %1323 = vst.msk [vmem:[%s2532_s14 + $0x8] sm:$0xff] %vm1254_vm2, %v1165_v31  ;;  %1328 = vst.msk [vmem:[%s2532_s14 + $0x28] sm:$0xff] %vm1254_vm2, %v1165_v31  ;;  %v1160_v37 = vld [vmem:[%s2522_s4] sm:$0x7] }
  0x93   :  { %1953 = vmatpush3.bf16.msra.mxu0 %v1952_v53  ;;  %v722_v53 = vld [vmem:[#allocation5 + $0x330] sm:$0xff]  ;;  %v1207_v39 = vrot.slane %v1160_v37, %v1206_v36 }
  0x94   :  { %1969 = vmatpush3.bf16.msra.mxu1 %v1968_v55  ;;  %1955 = vmatprep.subr.bf16.mxu0 %v1954_v56  ;;  %v699_v56 = vld [vmem:[#allocation5 + $0x278] sm:$0xff]  ;;  %v2004_v5 = vpack.c.bf16 %v723_v54, %v722_v53 }
  0x95   :  { %1971 = vmatprep.subr.bf16.mxu1 %v1970_v60  ;;  %v1988_v20 = vpack.c.bf16 %v699_v56, %v698_v52  ;;  %v724_v60 = vld [vmem:[#allocation5 + $0x340] sm:$0xff] }
  0x97   :  { %1957 = vmatpush3.bf16.msra.mxu0 %v1956_v1  ;;  %v2008_v1 = vpack.c.bf16 %v725_v50, %v724_v60 }
  0x98   :  { %1973 = vmatpush3.bf16.msra.mxu1 %v1972_v3  ;;  %1991 = vmatprep.subr.bf16.mxu0 %v1990_v4  ;;  %v726_v3 = vld [vmem:[#allocation5 + $0x350] sm:$0xff]  ;;  %v727_v4 = vld [vmem:[#allocation5 + $0x358] sm:$0xff] }
  0x99   :  { %1975 = vmatprep.subr.bf16.mxu1 %v1974_v9  ;;  %v750_v9 = vld [vmem:[#allocation5 + $0x410] sm:$0xff]  ;;  %v2012_v12 = vpack.c.bf16 %v727_v4, %v726_v3 }
  0x9a   :  { %945 = vmatmul.mubr.f32.vlgmr.msra.gmra.mrb[6].mxu0 %v2288_v10  ;;  %v714_v10 = vld [vmem:[#allocation5 + $0x2f0] sm:$0xff]  ;;  %v2026_v16 = vpack.c.bf16 %v751_v11, %v750_v9 }
  0x9b   :  { %1993 = vmatpush3.bf16.msra.mxu0 %v1992_v13  ;;  %1084 = vmatprep.mubr.f32.mxu0 %v792_v29  ;;  %v1986_v55 = vpack.c.bf16 %v715_v47, %v714_v10  ;;  %v746_v13 = vld [vmem:[#allocation5 + $0x3f0] sm:$0xff]  ;;  %v747_v29 = vld [vmem:[#allocation5 + $0x3f8] sm:$0xff]  ;;  %v1187_v47 = vrot.slane %v1160_v37, %v2402_v42 }
  0x9c   :  { %1977 = vmatpush3.bf16.msra.mxu1 %v1976_v18  ;;  %1995 = vmatprep.subr.bf16.mxu0 %v1994_v19  ;;  %v752_v18 = vld [vmem:[#allocation5 + $0x420] sm:$0xff]  ;;  %v753_v19 = vld [vmem:[#allocation5 + $0x428] sm:$0xff] }
  0x9d   :  { %1979 = vmatprep.subr.bf16.mxu1 %v1978_v24  ;;  %v2029_v24 = vpack.c.bf16 %v753_v19, %v752_v18  ;;  %v1416_v18 = vld [vmem:[%s2525_s7] ss:$0 sm:$0xff] }
  0x9f   :  { %1997 = vmatpush3.bf16.msra.mxu0 %v1996_v33 }
  0xa0   :  { %1981 = vmatpush3.bf16.msra.mxu1 %v1980_v34  ;;  %1999 = vmatprep.subr.bf16.mxu0 %v1998_v35 }
  0xa1   :  { %1983 = vmatprep.subr.bf16.mxu1 %v1982_v43  ;;  %v1161_v43 = vld [vmem:[%s2522_s4 + $0x4] sm:$0x7] }
  0xa2   :  { %v1211_v10 = vrot.slane %v1161_v43, %v1206_v36  ;;  %v1417_v36 = vld [vmem:[%s2526_s8] ss:$0 sm:$0xff] }
  0xa3   :  { %2001 = vmatpush3.bf16.msra.mxu0 %v2000_v48  ;;  %v1191_v48 = vrot.slane %v1161_v43, %v2402_v42 }
  0xa4   :  { %1985 = vmatpush3.bf16.msra.mxu1 %v1984_v49  ;;  %2003 = vmatprep.subr.bf16.mxu0 %v2002_v51  ;;  %v1167_v49 = vld [vmem:[%s2527_s9 + $0x18] sm:$0x3f]  ;;  %v1230_v51 = vsub.s32 2, %v2247_v0 }
  0xa5   :  { %1987 = vmatprep.subr.bf16.mxu1 %v1986_v55  ;;  %1326 = vst.msk [vmem:[%s2532_s14 + $0x18] sm:$0x3f] %vm1325_vm3, %v1167_v49  ;;  %1330 = vst.msk [vmem:[%s2532_s14 + $0x38] sm:$0x3f] %vm1325_vm3, %v1167_v49 }
  0xa6   :  { %v1231_v60 = vrot.slane %v1160_v37, %v1230_v51  ;;  %v1235_v50 = vrot.slane %v1161_v43, %v1230_v51 }
  0xa7   :  { %2005 = vmatpush3.bf16.msra.mxu0 %v2004_v5 }
  0xa8   :  { %1989 = vmatpush3.bf16.msra.mxu1 %v1988_v20  ;;  %2007 = vmatprep.subr.bf16.mxu0 %v2006_v59 }
  0xa9   :  { %2022 = vmatprep.subr.bf16.mxu1 %v2137_v41 }
  0xab   :  { %1015 = vmatmul.mubr.f32.vlgmr.msra.gmra.mrb[6].mxu1 %v2309_v17  ;;  %2009 = vmatpush3.bf16.msra.mxu0 %v2008_v1  ;;  %v2018_v17 = vpack.c.bf16 %v747_v29, %v746_v13 }
  0xac   :  { %2011 = vmatprep.subr.bf16.mxu0 %v2010_v40  ;;  %2024 = vmatpush3.bf16.msra.mxu1 %v2023_v6 }
  0xad   :  { %2025 = vmatprep.subr.bf16.mxu1 %v2137_v41  ;;  %1751 = vmatprep.mubr.msk.f32.mxu1 %vm2138_vm0, %v2139_v38  ;;  %v1414_v38 = vld.sshfl [vmem:[%s2520_s2 + $0x10] sm:$0x3 pattern:$0x76325410] }
  0xaf   :  { %2013 = vmatpush3.bf16.msra.mxu0 %v2012_v12 }
  0xb0   :  { %2015 = vmatprep.subr.bf16.mxu0 %v2014_v46  ;;  %2027 = vmatpush3.bf16.msra.mxu1 %v2026_v16 }
  0xb1   :  { %2028 = vmatprep.subr.bf16.mxu1 %v2137_v41 }
  0xb3   :  { %2017 = vmatpush3.bf16.msra.mxu0 %v2016_v21 }
  0xb4   :  { %2019 = vmatprep.subr.bf16.mxu0 %v2018_v17  ;;  %2030 = vmatpush3.bf16.msra.mxu1 %v2029_v24 }
  0xb5   :  { %2031 = vmatprep.subr.bf16.mxu1 %v2137_v41  ;;  %v1166_v41 = vld [vmem:[%s2527_s9 + $0x10] sm:$0xff] }
  0xb6   :  { %1324 = vst.msk [vmem:[%s2532_s14 + $0x10] sm:$0xff] %vm1254_vm2, %v1166_v41  ;;  %1329 = vst.msk [vmem:[%s2532_s14 + $0x30] sm:$0xff] %vm1254_vm2, %v1166_v41 }
  0xb7   :  { %2021 = vmatpush3.bf16.msra.mxu0 %v2020_v27 }
  0xb8   :  { %2033 = vmatpush3.bf16.msra.mxu1 %v2032_v28 }
  0xba   :  { %1085 = vmatmul.mubr.f32.vlgmr.msra.gmra.mrb[8].mxu0 %v2340_v2 }
  0xbb   :  { %1752 = vmatmul.mubr.msk.f32.vlgmr.msra.gmra.mrb[8].mxu1 %vm263_vm1, %v1414_v38 }
  0xe2   :  { %v1198_v2 = vpop.permute.xlu1 %1197 }
  0xe3   :  { %v1212_v53 = vmul.f32 %v1207_v39, %v1198_v2  ;;  %v1214_v54 = vmul.f32 %v1211_v10, %v1198_v2 }
  0xe4   :  { %v1177_v33 = vpop.permute.xlu0 %1176 }
  0xe5   :  { %v1192_v55 = vmul.f32 %v1187_v47, %v1177_v33  ;;  %v1194_v56 = vmul.f32 %v1191_v48, %v1177_v33 }
  0xe7   :  { %v1216_v62 = vadd.f32 %v1212_v53, %v1192_v55  ;;  %v1218_v63 = vadd.f32 %v1214_v54, %v1194_v56 }
  0xe8   :  { %v1202_v34 = vpop.permute.xlu1 %1201 }
  0xe9   :  { %v1182_v35 = vpop.permute.xlu0 %1181  ;;  %v1213_v58 = vmul.f32 %v1207_v39, %v1202_v34  ;;  %v1215_v5 = vmul.f32 %v1211_v10, %v1202_v34 }
  0xea   :  { %v1193_v20 = vmul.f32 %v1187_v47, %v1182_v35  ;;  %v1195_v59 = vmul.f32 %v1191_v48, %v1182_v35 }
  0xec   :  { %v1217_v3 = vadd.f32 %v1213_v58, %v1193_v20  ;;  %v1219_v4 = vadd.f32 %v1215_v5, %v1195_v59 }
  0xee   :  { %v1270_v44 = vpop.permute.xlu1 %1269 }
  0xef   :  { %v1273_v6 = vmul.f32 %v1270_v44, %v1187_v47  ;;  %v1275_v9 = vmul.f32 %v1270_v44, %v1191_v48 }
  0xf0   :  { %v1265_v45 = vpop.permute.xlu0 %1264 }
  0xf1   :  { %v1272_v32 = vmul.f32 %v1265_v45, %v1187_v47  ;;  %v1274_v1 = vmul.f32 %v1265_v45, %v1191_v48 }
  0xf5   :  { %v1282_v52 = vpop.permute.xlu1 %1281  ;;  %v1278_v57 = vpop.permute.xlu0 %1277 }
  0xf6   :  { %v1284_v61 = vmul.f32 %v1278_v57, %v1207_v39  ;;  %v1286_v40 = vmul.f32 %v1278_v57, %v1211_v10  ;;  %v1285_v11 = vmul.f32 %v1282_v52, %v1207_v39  ;;  %v1287_v13 = vmul.f32 %v1282_v52, %v1211_v10 }
  0xf8   :  { %v1288_v29 = vadd.f32 %v1284_v61, %v1272_v32  ;;  %v1290_v23 = vadd.f32 %v1286_v40, %v1274_v1  ;;  %v1289_v37 = vadd.f32 %v1285_v11, %v1273_v6  ;;  %v1291_v43 = vadd.f32 %v1287_v13, %v1275_v9 }
 0x101   :  { %v1222_v7 = vpop.permute.xlu1 %1221 }
 0x102   :  { %v1236_v12 = vmul.f32 %v1231_v60, %v1222_v7  ;;  %v1238_v46 = vmul.f32 %v1235_v50, %v1222_v7  ;;  %v1226_v14 = vpop.permute.xlu0 %1225 }
 0x103   :  { %v1237_v19 = vmul.f32 %v1231_v60, %v1226_v14  ;;  %v1239_v21 = vmul.f32 %v1235_v50, %v1226_v14 }
 0x104   :  { %v1240_v24 = vadd.f32 %v1236_v12, %v1216_v62  ;;  %v1242_v25 = vadd.f32 %v1238_v46, %v1218_v63 }
 0x105   :  { %v1241_v27 = vadd.f32 %v1237_v19, %v1217_v3  ;;  %v1243_v28 = vadd.f32 %v1239_v21, %v1219_v4  ;;  %v1294_v38 = vpop.permute.xlu1 %1293 }
 0x106   :  { %v1250_v30 = vadd.f32 %v1416_v18, %v1240_v24  ;;  %v1252_v31 = vadd.f32 %v1416_v18, %v1242_v25  ;;  %v1300_v41 = vmul.f32 %v1294_v38, %v1231_v60  ;;  %v1302_v2 = vmul.f32 %v1294_v38, %v1235_v50 }
 0x107   :  { %v1251_v34 = vadd.f32 %v1416_v18, %v1241_v27  ;;  %v1253_v35 = vadd.f32 %v1416_v18, %v1243_v28 }
 0x108   :  { %1255 = vst.msk [vmem:[%s2530_s12] sm:$0xff] %vm1254_vm2, %v1250_v30  ;;  %1258 = vst.msk [vmem:[%s2530_s12 + $0x10] sm:$0xff] %vm1254_vm2, %v1252_v31  ;;  %v1304_v44 = vadd.f32 %v1300_v41, %v1288_v29  ;;  %v1306_v45 = vadd.f32 %v1302_v2, %v1290_v23 }
 0x109   :  { %1257 = vst.msk [vmem:[%s2530_s12 + $0x8] sm:$0x3] %vm1256_vm4, %v1251_v34  ;;  %1259 = vst.msk [vmem:[%s2530_s12 + $0x18] sm:$0x3] %vm1256_vm4, %v1253_v35  ;;  %v1298_v39 = vpop.permute.xlu1 %1297 }
 0x10a   :  { %v1314_v10 = vadd.f32 %v1417_v36, %v1304_v44  ;;  %v1316_v47 = vadd.f32 %v1417_v36, %v1306_v45  ;;  %v1301_v48 = vmul.f32 %v1298_v39, %v1231_v60  ;;  %v1303_v49 = vmul.f32 %v1298_v39, %v1235_v50 }
 0x10c   :  { %1318 = vst.msk [vmem:[%s2531_s13] sm:$0xff] %vm1254_vm2, %v1314_v10  ;;  %1320 = vst.msk [vmem:[%s2531_s13 + $0x10] sm:$0xff] %vm1254_vm2, %v1316_v47  ;;  %v1305_v51 = vadd.f32 %v1301_v48, %v1289_v37  ;;  %v1307_v52 = vadd.f32 %v1303_v49, %v1291_v43 }
 0x10e   :  { %v1315_v53 = vadd.f32 %v1417_v36, %v1305_v51  ;;  %v1317_v54 = vadd.f32 %v1417_v36, %v1307_v52 }
 0x110   :  { %1319 = vst.msk [vmem:[%s2531_s13 + $0x8] sm:$0x3] %vm1256_vm4, %v1315_v53  ;;  %1321 = vst.msk [vmem:[%s2531_s13 + $0x18] sm:$0x3] %vm1256_vm4, %v1317_v54 }
 0x11d   :  { %v1450_v8 = vpop.f32.mrb[0].mxu0 }
 0x11e   :  { %v1485_v15 = vpop.f32.mrb[0].mxu1  ;;  %v1451_v16 = vpop.f32.mrb[1].mxu0 }
 0x11f   :  { %v1452_v17 = vadd.f32 %v1451_v16, %v1450_v8  ;;  %v1486_v22 = vpop.f32.mrb[1].mxu1 }
 0x120   :  { %v1487_v26 = vadd.f32 %v1486_v22, %v1485_v15 }
 0x122   :  { %v403_v33 = vadd.f32 %v1487_v26, %v1452_v17 }
 0x13d   :  { %v1520_v55 = vpop.f32.mrb[2].mxu0 }
 0x13e   :  { %v1521_v56 = vpop.f32.mrb[3].mxu0  ;;  %v1555_v57 = vpop.f32.mrb[2].mxu1 }
 0x13f   :  { %v1522_v58 = vadd.f32 %v1521_v56, %v1520_v55  ;;  %v1556_v5 = vpop.f32.mrb[3].mxu1 }
 0x140   :  { %v1557_v20 = vadd.f32 %v1556_v5, %v1555_v57 }
 0x141   :  { %v473_v59 = vadd.f32 %v1522_v58, %v403_v33 }
 0x143   :  { %v543_v60 = vadd.f32 %v1557_v20, %v473_v59 }
 0x14d   :  { %v612_v50 = vpop.f32.mrb[4].mxu0 }
 0x14e   :  { %v613_v32 = vadd.f32 %v612_v50, %v543_v60  ;;  %v1734_v61 = vpop.f32.mrb[5].mxu0 }
 0x150   :  { %616 = vst [vmem:[#allocation7] sm:$0x3] %v613_v32 }
 0x151   :  { %2113 = shalt.err (!%p2110_p6)
}
 0x152   :  { %s2114_s16 = scalar_lea.hbm %s2529_s11, 32 }
 0x153   :  { %p2115_p7 = scmp.ne.s32.totalorder %s2529_s11, %s2114_s16  ;;  %p2118_p8 = scmp.lt.u32.totalorder %s2114_s16, %s2529_s11 }
 0x155   :  { %p2120_p9 = pnand %p2118_p8, %p2115_p7 }
 0x157   :  { %2123 = shalt.err (!%p2120_p9)
}
 0x158   :  { %1389 = dma.vmem_to_hbm [thread:$0]  %s1387_s28, 32, %s2529_s11, [#allocation4]   ;;  %v2142_v12 = vmov 1966171168   ;;  %v1168_v25 = vld [vmem:[%s2528_s10] sm:$0xff]  ;;  %v1169_v26 = vld [vmem:[%s2528_s10 + $0x8] sm:$0xff] }
 0x159   :  { %v1333_v46 = vunpack.c.l.s4 %v2142_v12  ;;  %v1170_v27 = vld [vmem:[%s2528_s10 + $0x10] sm:$0xff] }
 0x15b   :  { %v1334_v15 = vunpack.c.0.s8 %v1333_v46 }
 0x15d   :  { %v1337_v21 = vsub.s32 %v1334_v15, %v2247_v0  ;;  %v1171_v0 = vld [vmem:[%s2528_s10 + $0x18] sm:$0x3f] }
 0x15e   :  { %v1599_v62 = vpop.f32.mrb[4].mxu1 }
 0x15f   :  { %v1600_v63 = vpop.f32.mrb[5].mxu1 }
 0x160   :  { %v1601_v1 = vadd.f32 %v1600_v63, %v1599_v62 }
 0x16d   :  { %v1634_v40 = vpop.f32.mrb[6].mxu0 }
 0x16e   :  { %v1635_v3 = vpop.f32.mrb[7].mxu0 }
 0x16f   :  { %v1636_v4 = vadd.f32 %v1635_v3, %v1634_v40 }
 0x171   :  { %v947_v6 = vadd.f32 %v1636_v4, %v1601_v1 }
 0x17e   :  { %v1669_v7 = vpop.f32.mrb[6].mxu1 }
 0x17f   :  { %v1670_v8 = vpop.f32.mrb[7].mxu1 }
 0x180   :  { %v1671_v9 = vadd.f32 %v1670_v8, %v1669_v7 }
 0x182   :  { %v1017_v11 = vadd.f32 %v1671_v9, %v947_v6 }
 0x18d   :  { %v1704_v14 = vpop.f32.mrb[8].mxu0 }
 0x18e   :  { %v1705_v16 = vpop.f32.mrb[9].mxu0  ;;  %v1156_v13 = vpop.f32.mrb[8].mxu1 }
 0x18f   :  { %v1706_v29 = vadd.f32 %v1705_v16, %v1704_v14  ;;  %v1753_v18 = vpop.f32.mrb[9].mxu1 }
 0x191   :  { %v1087_v19 = vadd.f32 %v1706_v29, %v1017_v11 }
 0x193   :  { %v1157_v17 = vadd.f32 %v1156_v13, %v1087_v19 }
 0x195   :  { %v1338_v22 = vrot.slane %v1157_v17, %v1337_v21 }
 0x197   :  { %v1339_v23 = vcombine.high %v1338_v22, %v1338_v22  ;;  %v1346_v24 = vrot.slane %v1338_v22, %v1337_v21 }
 0x199   :  { %v1353_v28 = vrot.slane %v1339_v23, %v1337_v21  ;;  %v1357_v38 = vrot.slane %v1346_v24, %v2402_v42 }
 0x19b   :  { %v1361_v30 = vrot.slane %v1353_v28, %v2402_v42  ;;  %v1364_v31 = vadd.f32 %v1357_v38, %v1168_v25  ;;  %v1365_v41 = vadd.f32 %v1357_v38, %v1169_v26  ;;  %v1366_v2 = vadd.f32 %v1357_v38, %v1170_v27 }
 0x19c   :  { %v1367_v33 = vadd.f32 %v1357_v38, %v1171_v0 }
 0x19d   :  { %v1368_v34 = vadd.f32 %v1361_v30, %v1168_v25  ;;  %v1369_v35 = vadd.f32 %v1361_v30, %v1169_v26  ;;  %v1370_v36 = vadd.f32 %v1361_v30, %v1170_v27  ;;  %v1371_v37 = vadd.f32 %v1361_v30, %v1171_v0  ;;  %1372 = vst.msk [vmem:[%s2533_s15] sm:$0xff] %vm1254_vm2, %v1364_v31 }
 0x19e   :  { %1373 = vst.msk [vmem:[%s2533_s15 + $0x8] sm:$0xff] %vm1254_vm2, %v1365_v41  ;;  %1374 = vst.msk [vmem:[%s2533_s15 + $0x10] sm:$0xff] %vm1254_vm2, %v1366_v2 }
 0x19f   :  { %1375 = vst.msk [vmem:[%s2533_s15 + $0x18] sm:$0x3f] %vm1325_vm3, %v1367_v33  ;;  %1379 = vst.msk [vmem:[%s2533_s15 + $0x38] sm:$0x3f] %vm1325_vm3, %v1371_v37 }
 0x1a0   :  { %1376 = vst.msk [vmem:[%s2533_s15 + $0x20] sm:$0xff] %vm1254_vm2, %v1368_v34  ;;  %1377 = vst.msk [vmem:[%s2533_s15 + $0x28] sm:$0xff] %vm1254_vm2, %v1369_v35 }
 0x1a1   :  { %1378 = vst.msk [vmem:[%s2533_s15 + $0x30] sm:$0xff] %vm1254_vm2, %v1370_v36 }
 0x1a2   :  { %2128 = dma.done.wait [#allocation4], 32  }
 0x1a3   :  { %2129 = vsyncadd [#allocation4], 4294967264 }
 0x1a4   :  { %1409 = vsyncpa [#allocation3], 1 }
 0x1a5   :  { %1410 = vsyncpa [#allocation6], 1 }
 0x1a6   :  { %1411 = vsyncpa [#allocation4], 1 }

</bundles_post_ra>
